<compile_context>
chip_gen: v5e
topology: v5e:2x2
jax: 0.10.0
libtpu: 0.0.40
codegen_flags: <defaults>
</compile_context>

<pallas_src>
import math

import jax
import jax.numpy as jnp
from jax import lax
from jax.experimental import pallas as pl
from jax.experimental.pallas import tpu as pltpu

# ---- model hyper-parameters (small, consistent with the module) -------------
VOCAB = 64
D_MODEL = 32
N_HEAD = 4
N_LAYERS = 2
MAX_LEN = 192
HEAD_DIM = D_MODEL // N_HEAD
EPS = 1e-5

LANE = 128            # TPU lane width: slab columns + padded vocab head
VOCAB_PAD = LANE      # pad 64 -> 128 so the final store is lane-dense


# ---- weight-slab layout (shared by packer and kernel) ------------------------
def _build_slab_layout():
    entries = []
    for l in range(N_LAYERS):
        entries += [
            (f"n1g_{l}", 1, D_MODEL), (f"n1b_{l}", 1, D_MODEL),
            (f"wqkv_{l}", D_MODEL, 3 * D_MODEL), (f"bqkv_{l}", 1, 3 * D_MODEL),
            (f"wo_{l}", D_MODEL, D_MODEL), (f"bo_{l}", 1, D_MODEL),
            (f"n2g_{l}", 1, D_MODEL), (f"n2b_{l}", 1, D_MODEL),
            (f"w1_{l}", D_MODEL, 4 * D_MODEL), (f"b1_{l}", 1, 4 * D_MODEL),
            (f"w2_{l}", 4 * D_MODEL, D_MODEL), (f"b2_{l}", 1, D_MODEL),
        ]
    entries += [("ng", 1, D_MODEL), ("nb", 1, D_MODEL),
                ("wout", D_MODEL, VOCAB_PAD), ("bout", 1, VOCAB_PAD)]
    layout, row = {}, 0
    for name, nr, nc in entries:
        layout[name] = (row, nr, nc)          # (row offset, rows, cols) read by the kernel
        row += ((nr + 7) // 8) * 8            # keep every entry sublane(8)-aligned
    return layout, ((row + 7) // 8) * 8


_LAYOUT, _SLAB_ROWS = _build_slab_layout()


# ---- shared math (kernel + pure-JAX reference) --------------------------------
def _layernorm(x, g, b):
    mean = jnp.mean(x, axis=-1, keepdims=True)
    var = jnp.mean(jnp.square(x - mean), axis=-1, keepdims=True)
    return (x - mean) * lax.rsqrt(var + EPS) * g + b


def _gelu_exact(x):
    # matches torch.nn.GELU() default (erf-based)
    return 0.5 * x * (1.0 + lax.erf(x * (1.0 / math.sqrt(2.0))))


# ---- fused Pallas kernel -------------------------------------------------------
def _w(slab_ref, name):
    r, nr, nc = _LAYOUT[name]
    return slab_ref[r:r + nr, 0:nc]           # static-offset slice of the single weight slab


def fused_generator_kernel(x_ref, slab_ref, out_ref):
    x = x_ref[0]                              # (T, C) f32 residual stream, lives in vregs/VMEM
    T = x.shape[0]

    # additive causal bias {0, -1e30}: built once, shared by every layer and head
    row = lax.broadcasted_iota(jnp.int32, (T, T), 0)
    col = lax.broadcasted_iota(jnp.int32, (T, T), 1)
    mask_bias = jnp.where(col > row, jnp.float32(-1e30), jnp.float32(0.0))
    scale = jnp.float32(1.0 / math.sqrt(HEAD_DIM))

    def split_heads(a_t):                     # (C, T) -> (H, T, Dh): free reshape + minor transpose
        return jnp.transpose(a_t.reshape(N_HEAD, HEAD_DIM, T), (0, 2, 1))

    for l in range(N_LAYERS):                 # static unroll over layers
        # --- self-attention branch (pre-residual LayerNorm) ---
        xn = _layernorm(x, _w(slab_ref, f"n1g_{l}"), _w(slab_ref, f"n1b_{l}"))
        # single merged QKV projection, output laid out [q(0:32) | k(32:64) | v(64:96)]
        qkv = jnp.dot(xn, _w(slab_ref, f"wqkv_{l}"),
                      preferred_element_type=jnp.float32) + _w(slab_ref, f"bqkv_{l}")
        qkv_t = qkv.T                                                     # (3C, T)
        qh = split_heads(qkv_t[0:D_MODEL]) * scale                        # (H, T, Dh)
        kh = split_heads(qkv_t[D_MODEL:2 * D_MODEL])
        vh = split_heads(qkv_t[2 * D_MODEL:3 * D_MODEL])

        # batched scores + causal softmax (reciprocal on the EUP slot)
        s = jnp.einsum("hqd,hkd->hqk", qh, kh,
                       preferred_element_type=jnp.float32) + mask_bias    # (H, T, T)
        s = s - jnp.max(s, axis=-1, keepdims=True)
        p = jnp.exp(s)
        p = p * pl.reciprocal(jnp.sum(p, axis=-1, keepdims=True), approx=True)

        # batched PV, head concat back to (T, C), ONE (T,32)@(32,32) output projection
        o = jnp.einsum("hqk,hkd->hqd", p, vh,
                       preferred_element_type=jnp.float32)                # (H, T, Dh)
        o2 = jnp.transpose(o, (0, 2, 1)).reshape(D_MODEL, T).T            # (T, C)
        x = x + jnp.dot(o2, _w(slab_ref, f"wo_{l}"),
                        preferred_element_type=jnp.float32) + _w(slab_ref, f"bo_{l}")

        # --- feed-forward branch ---
        xn2 = _layernorm(x, _w(slab_ref, f"n2g_{l}"), _w(slab_ref, f"n2b_{l}"))
        h1 = _gelu_exact(jnp.dot(xn2, _w(slab_ref, f"w1_{l}"),
                                 preferred_element_type=jnp.float32) + _w(slab_ref, f"b1_{l}"))
        x = x + jnp.dot(h1, _w(slab_ref, f"w2_{l}"),
                        preferred_element_type=jnp.float32) + _w(slab_ref, f"b2_{l}")

    # --- final LayerNorm + lane-dense (N=128) vocab head ---
    xn = _layernorm(x, _w(slab_ref, "ng"), _w(slab_ref, "nb"))
    out_ref[0] = jnp.dot(xn, _w(slab_ref, "wout"),
                         preferred_element_type=jnp.float32) + _w(slab_ref, "bout")


# ---- host-side weight packing (one (rows,128) slab, zero-padded) --------------
def pack_params(params):
    slab = jnp.zeros((_SLAB_ROWS, LANE), jnp.float32)

    def put(slab, name, arr):
        r, _, _ = _LAYOUT[name]
        arr = jnp.asarray(arr, jnp.float32)
        if arr.ndim == 1:
            arr = arr[None, :]
        return slab.at[r:r + arr.shape[0], 0:arr.shape[1]].set(arr)

    for l, blk in enumerate(params["blocks"]):
        for key in ("n1g", "n1b", "wqkv", "bqkv", "wo", "bo",
                    "n2g", "n2b", "w1", "b1", "w2", "b2"):
            slab = put(slab, f"{key}_{l}", blk[key])
    slab = put(slab, "ng", params["ng"])
    slab = put(slab, "nb", params["nb"])
    slab = put(slab, "wout", params["wout"])   # (32,64): padded vocab columns stay zero
    slab = put(slab, "bout", params["bout"])
    return slab


# ---- Pallas wrapper ------------------------------------------------------------
def generator_transformer_forward(tokens, params):
    B, T = tokens.shape
    # glue: token + positional embedding gather stays in plain JAX
    h = (params["tok_emb"][tokens] + params["pos_emb"][:T][None, :, :]).astype(jnp.float32)
    slab = pack_params(params)

    out = pl.pallas_call(
        fused_generator_kernel,
        out_shape=jax.ShapeDtypeStruct((B, T, VOCAB_PAD), jnp.float32),
        grid=(B,),
        in_specs=[pl.BlockSpec((1, T, D_MODEL), lambda b: (b, 0, 0)),
                  pl.BlockSpec((_SLAB_ROWS, LANE), lambda b: (0, 0))],
        out_specs=pl.BlockSpec((1, T, VOCAB_PAD), lambda b: (b, 0, 0)),
        compiler_params=pltpu.CompilerParams(dimension_semantics=("parallel",)),
    )(h, slab)
    return out[:, :, :VOCAB]                   # drop the lane padding of the vocab head


# ---- deterministic parameter init (synthetic weights) --------------------------
def init_params(key):
    def normal(k, shape, std=0.02):
        return (std * jax.random.normal(k, shape)).astype(jnp.float32)

    keys = iter(jax.random.split(key, 8 + 8 * N_LAYERS))
    params = {
        "tok_emb": normal(next(keys), (VOCAB, D_MODEL)),
        "pos_emb": normal(next(keys), (MAX_LEN, D_MODEL)),
        "ng": jnp.ones((1, D_MODEL), jnp.float32),
        "nb": jnp.zeros((1, D_MODEL), jnp.float32),
        "wout": normal(next(keys), (D_MODEL, VOCAB)),
        "bout": normal(next(keys), (1, VOCAB)),
        "blocks": [],
    }
    for _ in range(N_LAYERS):
        params["blocks"].append(dict(
            n1g=jnp.ones((1, D_MODEL), jnp.float32),
            n1b=jnp.zeros((1, D_MODEL), jnp.float32),
            wqkv=normal(next(keys), (D_MODEL, 3 * D_MODEL)),   # (in, 3*out), cols = [q|k|v]
            bqkv=normal(next(keys), (1, 3 * D_MODEL)),
            wo=normal(next(keys), (D_MODEL, D_MODEL)),
            bo=normal(next(keys), (1, D_MODEL)),
            n2g=jnp.ones((1, D_MODEL), jnp.float32),
            n2b=jnp.zeros((1, D_MODEL), jnp.float32),
            w1=normal(next(keys), (D_MODEL, 4 * D_MODEL)),
            b1=normal(next(keys), (1, 4 * D_MODEL)),
            w2=normal(next(keys), (4 * D_MODEL, D_MODEL)),
            b2=normal(next(keys), (1, D_MODEL)),
        ))
    return params


# ---- pure-JAX reference (same math, no Pallas) ----------------------------------
def reference_forward(tokens, params):
    B, T = tokens.shape
    x = params["tok_emb"][tokens] + params["pos_emb"][:T][None, :, :]
    causal = jnp.triu(jnp.ones((T, T), bool), 1)
    scale = 1.0 / math.sqrt(HEAD_DIM)
    for blk in params["blocks"]:
        xn = _layernorm(x, blk["n1g"][0], blk["n1b"][0])
        qkv = xn @ blk["wqkv"] + blk["bqkv"][0]
        q, k, v = jnp.split(qkv, 3, axis=-1)
        q = q.reshape(B, T, N_HEAD, HEAD_DIM).transpose(0, 2, 1, 3)
        k = k.reshape(B, T, N_HEAD, HEAD_DIM).transpose(0, 2, 1, 3)
        v = v.reshape(B, T, N_HEAD, HEAD_DIM).transpose(0, 2, 1, 3)
        s = jnp.einsum("bhqd,bhkd->bhqk", q, k) * scale
        s = jnp.where(causal[None, None], -jnp.inf, s)
        p = jax.nn.softmax(s, axis=-1)
        o = jnp.einsum("bhqk,bhkd->bhqd", p, v)
        o = o.transpose(0, 2, 1, 3).reshape(B, T, D_MODEL)
        x = x + (o @ blk["wo"] + blk["bo"][0])
        xn2 = _layernorm(x, blk["n2g"][0], blk["n2b"][0])
        h1 = _gelu_exact(xn2 @ blk["w1"] + blk["b1"][0])
        x = x + h1 @ blk["w2"] + blk["b2"][0]
    xn = _layernorm(x, params["ng"][0], params["nb"][0])
    return xn @ params["wout"] + params["bout"][0]


# TODO(synk): generate()/generate_beam_search() (tokenizer, top-k sampling, multinomial,
# beam search) are host-side autoregressive loops around this forward; not kernel material.

if __name__ == "__main__":
    key = jax.random.PRNGKey(0)
    k_tok, k_par = jax.random.split(key)

    B, T = 2, 8
    tokens = jax.random.randint(k_tok, (B, T), 0, VOCAB, dtype=jnp.int32)
    params = init_params(k_par)

    logits = generator_transformer_forward(tokens, params)
    logits = jax.block_until_ready(logits)

    ref = reference_forward(tokens, params)
    assert logits.shape == (B, T, VOCAB)
    # tolerance allows for the EUP approximate-reciprocal softmax denominator
    assert jnp.allclose(logits, ref, atol=5e-4, rtol=5e-4), (
        float(jnp.max(jnp.abs(logits - ref))))

    print("KERNEL_OK")
</pallas_src>

<mosaic_0001>
module attributes {stable_mosaic.version = 11 : i64} {
  func.func @fused_generator_kernel(%arg0: i32, %arg1: memref<1x8x32xf32, #tpu.memory_space<vmem>>, %arg2: memref<632x128xf32, #tpu.memory_space<vmem>>, %arg3: memref<1x8x128xf32, #tpu.memory_space<vmem>>) attributes {dimension_semantics = [#tpu.dimension_semantics<parallel>], iteration_bounds = array<i64: 2>, scalar_prefetch = 0 : i64, scratch_operands = 0 : i64, tpu.core_type = #tpu.core_type<tc>, window_params = [{transform_indices = @transform_0, window_bounds = array<i64: 1, 8, 32>}, {pipeline_mode = #tpu.pipeline_mode<synchronous>, transform_indices = @transform_1, window_bounds = array<i64: 632, 128>}, {transform_indices = @transform_2, window_bounds = array<i64: 1, 8, 128>}]} {
    %c0 = arith.constant 0 : index
    %c0_0 = arith.constant 0 : index
    %c0_1 = arith.constant 0 : index
    %0 = vector.load %arg1[%c0, %c0_0, %c0_1] : memref<1x8x32xf32, #tpu.memory_space<vmem>>, vector<1x8x32xf32>
    %1 = vector.shape_cast %0 : vector<1x8x32xf32> to vector<8x32xf32>
    %2 = tpu.iota {dimensions = array<i32: 0>} : vector<8x8xi32>
    %3 = tpu.iota {dimensions = array<i32: 1>} : vector<8x8xi32>
    %4 = arith.cmpi sgt, %3, %2 : vector<8x8xi32>
    %cst = arith.constant -1.000000e+30 : f32
    %cst_2 = arith.constant 0.000000e+00 : f32
    %5 = vector.broadcast %cst : f32 to vector<8x8xf32>
    %6 = vector.broadcast %cst_2 : f32 to vector<8x8xf32>
    %7 = arith.select %4, %5, %6 : vector<8x8xi1>, vector<8x8xf32>
    %c0_3 = arith.constant 0 : index
    %c0_4 = arith.constant 0 : index
    %8 = vector.load %arg2[%c0_3, %c0_4] : memref<632x128xf32, #tpu.memory_space<vmem>>, vector<1x32xf32>
    %c8 = arith.constant 8 : index
    %c0_5 = arith.constant 0 : index
    %9 = vector.load %arg2[%c8, %c0_5] : memref<632x128xf32, #tpu.memory_space<vmem>>, vector<1x32xf32>
    %cst_6 = arith.constant dense<0.000000e+00> : vector<8xf32>
    %10 = vector.multi_reduction <add>, %1, %cst_6 [1] : vector<8x32xf32> to vector<8xf32>
    %11 = vector.shape_cast %10 : vector<8xf32> to vector<8x1xf32>
    %cst_7 = arith.constant 3.200000e+01 : f32
    %12 = vector.broadcast %cst_7 : f32 to vector<8x1xf32>
    %13 = arith.divf %11, %12 : vector<8x1xf32>
    %14 = vector.broadcast %13 : vector<8x1xf32> to vector<8x32xf32>
    %15 = arith.subf %1, %14 : vector<8x32xf32>
    %16 = arith.mulf %15, %15 : vector<8x32xf32>
    %cst_8 = arith.constant dense<0.000000e+00> : vector<8xf32>
    %17 = vector.multi_reduction <add>, %16, %cst_8 [1] : vector<8x32xf32> to vector<8xf32>
    %18 = vector.shape_cast %17 : vector<8xf32> to vector<8x1xf32>
    %cst_9 = arith.constant 3.200000e+01 : f32
    %19 = vector.broadcast %cst_9 : f32 to vector<8x1xf32>
    %20 = arith.divf %18, %19 : vector<8x1xf32>
    %21 = vector.broadcast %13 : vector<8x1xf32> to vector<8x32xf32>
    %22 = arith.subf %1, %21 : vector<8x32xf32>
    %cst_10 = arith.constant 9.99999974E-6 : f32
    %23 = vector.broadcast %cst_10 : f32 to vector<8x1xf32>
    %24 = arith.addf %20, %23 : vector<8x1xf32>
    %25 = math.rsqrt %24 : vector<8x1xf32>
    %26 = vector.broadcast %25 : vector<8x1xf32> to vector<8x32xf32>
    %27 = arith.mulf %22, %26 : vector<8x32xf32>
    %28 = vector.broadcast %8 : vector<1x32xf32> to vector<8x32xf32>
    %29 = arith.mulf %27, %28 : vector<8x32xf32>
    %30 = vector.broadcast %9 : vector<1x32xf32> to vector<8x32xf32>
    %31 = arith.addf %29, %30 : vector<8x32xf32>
    %c16 = arith.constant 16 : index
    %c0_11 = arith.constant 0 : index
    %32 = vector.load %arg2[%c16, %c0_11] : memref<632x128xf32, #tpu.memory_space<vmem>>, vector<32x96xf32>
    %cst_12 = arith.constant dense<0.000000e+00> : vector<8x96xf32>
    %33 = tpu.matmul %31, %32, %cst_12 {dimension_numbers = #tpu.dot_dimension_numbers<[1], [0], [0], [1], [0, 0, 1, 1], [], []>} : vector<8x32xf32>, vector<32x96xf32>, vector<8x96xf32> -> vector<8x96xf32>
    %c48 = arith.constant 48 : index
    %c0_13 = arith.constant 0 : index
    %34 = vector.load %arg2[%c48, %c0_13] : memref<632x128xf32, #tpu.memory_space<vmem>>, vector<1x96xf32>
    %35 = vector.broadcast %34 : vector<1x96xf32> to vector<8x96xf32>
    %36 = arith.addf %33, %35 : vector<8x96xf32>
    %37 = tpu.transpose %36, [1, 0] : vector<8x96xf32> -> vector<96x8xf32>
    %38 = vector.extract_strided_slice %37 {offsets = [0, 0], sizes = [32, 8], strides = [1, 1]} : vector<96x8xf32> to vector<32x8xf32>
    %39 = vector.shape_cast %38 : vector<32x8xf32> to vector<4x8x8xf32>
    %40 = tpu.transpose %39, [0, 2, 1] : vector<4x8x8xf32> -> vector<4x8x8xf32>
    %cst_14 = arith.constant 0.353553385 : f32
    %41 = vector.broadcast %cst_14 : f32 to vector<4x8x8xf32>
    %42 = arith.mulf %40, %41 : vector<4x8x8xf32>
    %43 = vector.extract_strided_slice %37 {offsets = [32, 0], sizes = [32, 8], strides = [1, 1]} : vector<96x8xf32> to vector<32x8xf32>
    %44 = vector.shape_cast %43 : vector<32x8xf32> to vector<4x8x8xf32>
    %45 = tpu.transpose %44, [0, 2, 1] : vector<4x8x8xf32> -> vector<4x8x8xf32>
    %46 = vector.extract_strided_slice %37 {offsets = [64, 0], sizes = [32, 8], strides = [1, 1]} : vector<96x8xf32> to vector<32x8xf32>
    %47 = vector.shape_cast %46 : vector<32x8xf32> to vector<4x8x8xf32>
    %48 = tpu.transpose %47, [0, 2, 1] : vector<4x8x8xf32> -> vector<4x8x8xf32>
    "tpu.trace_start"() <{level = 10 : i32, message = "hqd,hkd->hqk"}> : () -> ()
    %cst_15 = arith.constant dense<0.000000e+00> : vector<4x8x8xf32>
    %49 = tpu.matmul %42, %45, %cst_15 {dimension_numbers = #tpu.dot_dimension_numbers<[2], [2], [1], [1], [0, 0, 0, 1, 1, 1], [0], [0]>} : vector<4x8x8xf32>, vector<4x8x8xf32>, vector<4x8x8xf32> -> vector<4x8x8xf32>
    "tpu.trace_stop"() : () -> ()
    %50 = vector.shape_cast %7 : vector<8x8xf32> to vector<1x8x8xf32>
    %51 = vector.broadcast %50 : vector<1x8x8xf32> to vector<4x8x8xf32>
    %52 = arith.addf %49, %51 : vector<4x8x8xf32>
    %cst_16 = arith.constant dense<0xFF800000> : vector<4x8xf32>
    %53 = vector.multi_reduction <maximumf>, %52, %cst_16 [2] : vector<4x8x8xf32> to vector<4x8xf32>
    %54 = vector.shape_cast %53 : vector<4x8xf32> to vector<4x8x1xf32>
    %55 = vector.broadcast %54 : vector<4x8x1xf32> to vector<4x8x8xf32>
    %56 = arith.subf %52, %55 : vector<4x8x8xf32>
    %57 = math.exp %56 : vector<4x8x8xf32>
    %cst_17 = arith.constant dense<0.000000e+00> : vector<4x8xf32>
    %58 = vector.multi_reduction <add>, %57, %cst_17 [2] : vector<4x8x8xf32> to vector<4x8xf32>
    %59 = vector.shape_cast %58 : vector<4x8xf32> to vector<4x8x1xf32>
    %60 = tpu.reciprocal %59 {approx = true} : vector<4x8x1xf32> -> vector<4x8x1xf32>
    %61 = vector.broadcast %60 : vector<4x8x1xf32> to vector<4x8x8xf32>
    %62 = arith.mulf %57, %61 : vector<4x8x8xf32>
    "tpu.trace_start"() <{level = 10 : i32, message = "hqk,hkd->hqd"}> : () -> ()
    %cst_18 = arith.constant dense<0.000000e+00> : vector<4x8x8xf32>
    %63 = tpu.matmul %62, %48, %cst_18 {dimension_numbers = #tpu.dot_dimension_numbers<[2], [1], [1], [2], [0, 0, 0, 1, 1, 2], [0], [0]>} : vector<4x8x8xf32>, vector<4x8x8xf32>, vector<4x8x8xf32> -> vector<4x8x8xf32>
    "tpu.trace_stop"() : () -> ()
    %64 = tpu.transpose %63, [0, 2, 1] : vector<4x8x8xf32> -> vector<4x8x8xf32>
    %65 = vector.shape_cast %64 : vector<4x8x8xf32> to vector<32x8xf32>
    %66 = tpu.transpose %65, [1, 0] : vector<32x8xf32> -> vector<8x32xf32>
    %c56 = arith.constant 56 : index
    %c0_19 = arith.constant 0 : index
    %67 = vector.load %arg2[%c56, %c0_19] : memref<632x128xf32, #tpu.memory_space<vmem>>, vector<32x32xf32>
    %cst_20 = arith.constant dense<0.000000e+00> : vector<8x32xf32>
    %68 = tpu.matmul %66, %67, %cst_20 {dimension_numbers = #tpu.dot_dimension_numbers<[1], [0], [0], [1], [0, 0, 1, 1], [], []>} : vector<8x32xf32>, vector<32x32xf32>, vector<8x32xf32> -> vector<8x32xf32>
    %69 = arith.addf %1, %68 : vector<8x32xf32>
    %c88 = arith.constant 88 : index
    %c0_21 = arith.constant 0 : index
    %70 = vector.load %arg2[%c88, %c0_21] : memref<632x128xf32, #tpu.memory_space<vmem>>, vector<1x32xf32>
    %71 = vector.broadcast %70 : vector<1x32xf32> to vector<8x32xf32>
    %72 = arith.addf %69, %71 : vector<8x32xf32>
    %c96 = arith.constant 96 : index
    %c0_22 = arith.constant 0 : index
    %73 = vector.load %arg2[%c96, %c0_22] : memref<632x128xf32, #tpu.memory_space<vmem>>, vector<1x32xf32>
    %c104 = arith.constant 104 : index
    %c0_23 = arith.constant 0 : index
    %74 = vector.load %arg2[%c104, %c0_23] : memref<632x128xf32, #tpu.memory_space<vmem>>, vector<1x32xf32>
    %cst_24 = arith.constant dense<0.000000e+00> : vector<8xf32>
    %75 = vector.multi_reduction <add>, %72, %cst_24 [1] : vector<8x32xf32> to vector<8xf32>
    %76 = vector.shape_cast %75 : vector<8xf32> to vector<8x1xf32>
    %cst_25 = arith.constant 3.200000e+01 : f32
    %77 = vector.broadcast %cst_25 : f32 to vector<8x1xf32>
    %78 = arith.divf %76, %77 : vector<8x1xf32>
    %79 = vector.broadcast %78 : vector<8x1xf32> to vector<8x32xf32>
    %80 = arith.subf %72, %79 : vector<8x32xf32>
    %81 = arith.mulf %80, %80 : vector<8x32xf32>
    %cst_26 = arith.constant dense<0.000000e+00> : vector<8xf32>
    %82 = vector.multi_reduction <add>, %81, %cst_26 [1] : vector<8x32xf32> to vector<8xf32>
    %83 = vector.shape_cast %82 : vector<8xf32> to vector<8x1xf32>
    %cst_27 = arith.constant 3.200000e+01 : f32
    %84 = vector.broadcast %cst_27 : f32 to vector<8x1xf32>
    %85 = arith.divf %83, %84 : vector<8x1xf32>
    %86 = vector.broadcast %78 : vector<8x1xf32> to vector<8x32xf32>
    %87 = arith.subf %72, %86 : vector<8x32xf32>
    %cst_28 = arith.constant 9.99999974E-6 : f32
    %88 = vector.broadcast %cst_28 : f32 to vector<8x1xf32>
    %89 = arith.addf %85, %88 : vector<8x1xf32>
    %90 = math.rsqrt %89 : vector<8x1xf32>
    %91 = vector.broadcast %90 : vector<8x1xf32> to vector<8x32xf32>
    %92 = arith.mulf %87, %91 : vector<8x32xf32>
    %93 = vector.broadcast %73 : vector<1x32xf32> to vector<8x32xf32>
    %94 = arith.mulf %92, %93 : vector<8x32xf32>
    %95 = vector.broadcast %74 : vector<1x32xf32> to vector<8x32xf32>
    %96 = arith.addf %94, %95 : vector<8x32xf32>
    %c112 = arith.constant 112 : index
    %c0_29 = arith.constant 0 : index
    %97 = vector.load %arg2[%c112, %c0_29] : memref<632x128xf32, #tpu.memory_space<vmem>>, vector<32x128xf32>
    %cst_30 = arith.constant dense<0.000000e+00> : vector<8x128xf32>
    %98 = tpu.matmul %96, %97, %cst_30 {dimension_numbers = #tpu.dot_dimension_numbers<[1], [0], [0], [1], [0, 0, 1, 1], [], []>} : vector<8x32xf32>, vector<32x128xf32>, vector<8x128xf32> -> vector<8x128xf32>
    %c144 = arith.constant 144 : index
    %c0_31 = arith.constant 0 : index
    %99 = vector.load %arg2[%c144, %c0_31] : memref<632x128xf32, #tpu.memory_space<vmem>>, vector<1x128xf32>
    %100 = vector.broadcast %99 : vector<1x128xf32> to vector<8x128xf32>
    %101 = arith.addf %98, %100 : vector<8x128xf32>
    %cst_32 = arith.constant 5.000000e-01 : f32
    %102 = vector.broadcast %cst_32 : f32 to vector<8x128xf32>
    %103 = arith.mulf %102, %101 : vector<8x128xf32>
    %cst_33 = arith.constant 0.707106769 : f32
    %104 = vector.broadcast %cst_33 : f32 to vector<8x128xf32>
    %105 = arith.mulf %101, %104 : vector<8x128xf32>
    %106 = math.erf %105 : vector<8x128xf32>
    %cst_34 = arith.constant 1.000000e+00 : f32
    %107 = vector.broadcast %cst_34 : f32 to vector<8x128xf32>
    %108 = arith.addf %107, %106 : vector<8x128xf32>
    %109 = arith.mulf %103, %108 : vector<8x128xf32>
    %c152 = arith.constant 152 : index
    %c0_35 = arith.constant 0 : index
    %110 = vector.load %arg2[%c152, %c0_35] : memref<632x128xf32, #tpu.memory_space<vmem>>, vector<128x32xf32>
    %cst_36 = arith.constant dense<0.000000e+00> : vector<8x32xf32>
    %111 = tpu.matmul %109, %110, %cst_36 {dimension_numbers = #tpu.dot_dimension_numbers<[1], [0], [0], [1], [0, 0, 1, 1], [], []>} : vector<8x128xf32>, vector<128x32xf32>, vector<8x32xf32> -> vector<8x32xf32>
    %112 = arith.addf %72, %111 : vector<8x32xf32>
    %c280 = arith.constant 280 : index
    %c0_37 = arith.constant 0 : index
    %113 = vector.load %arg2[%c280, %c0_37] : memref<632x128xf32, #tpu.memory_space<vmem>>, vector<1x32xf32>
    %114 = vector.broadcast %113 : vector<1x32xf32> to vector<8x32xf32>
    %115 = arith.addf %112, %114 : vector<8x32xf32>
    %c288 = arith.constant 288 : index
    %c0_38 = arith.constant 0 : index
    %116 = vector.load %arg2[%c288, %c0_38] : memref<632x128xf32, #tpu.memory_space<vmem>>, vector<1x32xf32>
    %c296 = arith.constant 296 : index
    %c0_39 = arith.constant 0 : index
    %117 = vector.load %arg2[%c296, %c0_39] : memref<632x128xf32, #tpu.memory_space<vmem>>, vector<1x32xf32>
    %cst_40 = arith.constant dense<0.000000e+00> : vector<8xf32>
    %118 = vector.multi_reduction <add>, %115, %cst_40 [1] : vector<8x32xf32> to vector<8xf32>
    %119 = vector.shape_cast %118 : vector<8xf32> to vector<8x1xf32>
    %cst_41 = arith.constant 3.200000e+01 : f32
    %120 = vector.broadcast %cst_41 : f32 to vector<8x1xf32>
    %121 = arith.divf %119, %120 : vector<8x1xf32>
    %122 = vector.broadcast %121 : vector<8x1xf32> to vector<8x32xf32>
    %123 = arith.subf %115, %122 : vector<8x32xf32>
    %124 = arith.mulf %123, %123 : vector<8x32xf32>
    %cst_42 = arith.constant dense<0.000000e+00> : vector<8xf32>
    %125 = vector.multi_reduction <add>, %124, %cst_42 [1] : vector<8x32xf32> to vector<8xf32>
    %126 = vector.shape_cast %125 : vector<8xf32> to vector<8x1xf32>
    %cst_43 = arith.constant 3.200000e+01 : f32
    %127 = vector.broadcast %cst_43 : f32 to vector<8x1xf32>
    %128 = arith.divf %126, %127 : vector<8x1xf32>
    %129 = vector.broadcast %121 : vector<8x1xf32> to vector<8x32xf32>
    %130 = arith.subf %115, %129 : vector<8x32xf32>
    %cst_44 = arith.constant 9.99999974E-6 : f32
    %131 = vector.broadcast %cst_44 : f32 to vector<8x1xf32>
    %132 = arith.addf %128, %131 : vector<8x1xf32>
    %133 = math.rsqrt %132 : vector<8x1xf32>
    %134 = vector.broadcast %133 : vector<8x1xf32> to vector<8x32xf32>
    %135 = arith.mulf %130, %134 : vector<8x32xf32>
    %136 = vector.broadcast %116 : vector<1x32xf32> to vector<8x32xf32>
    %137 = arith.mulf %135, %136 : vector<8x32xf32>
    %138 = vector.broadcast %117 : vector<1x32xf32> to vector<8x32xf32>
    %139 = arith.addf %137, %138 : vector<8x32xf32>
    %c304 = arith.constant 304 : index
    %c0_45 = arith.constant 0 : index
    %140 = vector.load %arg2[%c304, %c0_45] : memref<632x128xf32, #tpu.memory_space<vmem>>, vector<32x96xf32>
    %cst_46 = arith.constant dense<0.000000e+00> : vector<8x96xf32>
    %141 = tpu.matmul %139, %140, %cst_46 {dimension_numbers = #tpu.dot_dimension_numbers<[1], [0], [0], [1], [0, 0, 1, 1], [], []>} : vector<8x32xf32>, vector<32x96xf32>, vector<8x96xf32> -> vector<8x96xf32>
    %c336 = arith.constant 336 : index
    %c0_47 = arith.constant 0 : index
    %142 = vector.load %arg2[%c336, %c0_47] : memref<632x128xf32, #tpu.memory_space<vmem>>, vector<1x96xf32>
    %143 = vector.broadcast %142 : vector<1x96xf32> to vector<8x96xf32>
    %144 = arith.addf %141, %143 : vector<8x96xf32>
    %145 = tpu.transpose %144, [1, 0] : vector<8x96xf32> -> vector<96x8xf32>
    %146 = vector.extract_strided_slice %145 {offsets = [0, 0], sizes = [32, 8], strides = [1, 1]} : vector<96x8xf32> to vector<32x8xf32>
    %147 = vector.shape_cast %146 : vector<32x8xf32> to vector<4x8x8xf32>
    %148 = tpu.transpose %147, [0, 2, 1] : vector<4x8x8xf32> -> vector<4x8x8xf32>
    %cst_48 = arith.constant 0.353553385 : f32
    %149 = vector.broadcast %cst_48 : f32 to vector<4x8x8xf32>
    %150 = arith.mulf %148, %149 : vector<4x8x8xf32>
    %151 = vector.extract_strided_slice %145 {offsets = [32, 0], sizes = [32, 8], strides = [1, 1]} : vector<96x8xf32> to vector<32x8xf32>
    %152 = vector.shape_cast %151 : vector<32x8xf32> to vector<4x8x8xf32>
    %153 = tpu.transpose %152, [0, 2, 1] : vector<4x8x8xf32> -> vector<4x8x8xf32>
    %154 = vector.extract_strided_slice %145 {offsets = [64, 0], sizes = [32, 8], strides = [1, 1]} : vector<96x8xf32> to vector<32x8xf32>
    %155 = vector.shape_cast %154 : vector<32x8xf32> to vector<4x8x8xf32>
    %156 = tpu.transpose %155, [0, 2, 1] : vector<4x8x8xf32> -> vector<4x8x8xf32>
    "tpu.trace_start"() <{level = 10 : i32, message = "hqd,hkd->hqk"}> : () -> ()
    %cst_49 = arith.constant dense<0.000000e+00> : vector<4x8x8xf32>
    %157 = tpu.matmul %150, %153, %cst_49 {dimension_numbers = #tpu.dot_dimension_numbers<[2], [2], [1], [1], [0, 0, 0, 1, 1, 1], [0], [0]>} : vector<4x8x8xf32>, vector<4x8x8xf32>, vector<4x8x8xf32> -> vector<4x8x8xf32>
    "tpu.trace_stop"() : () -> ()
    %158 = vector.shape_cast %7 : vector<8x8xf32> to vector<1x8x8xf32>
    %159 = vector.broadcast %158 : vector<1x8x8xf32> to vector<4x8x8xf32>
    %160 = arith.addf %157, %159 : vector<4x8x8xf32>
    %cst_50 = arith.constant dense<0xFF800000> : vector<4x8xf32>
    %161 = vector.multi_reduction <maximumf>, %160, %cst_50 [2] : vector<4x8x8xf32> to vector<4x8xf32>
    %162 = vector.shape_cast %161 : vector<4x8xf32> to vector<4x8x1xf32>
    %163 = vector.broadcast %162 : vector<4x8x1xf32> to vector<4x8x8xf32>
    %164 = arith.subf %160, %163 : vector<4x8x8xf32>
    %165 = math.exp %164 : vector<4x8x8xf32>
    %cst_51 = arith.constant dense<0.000000e+00> : vector<4x8xf32>
    %166 = vector.multi_reduction <add>, %165, %cst_51 [2] : vector<4x8x8xf32> to vector<4x8xf32>
    %167 = vector.shape_cast %166 : vector<4x8xf32> to vector<4x8x1xf32>
    %168 = tpu.reciprocal %167 {approx = true} : vector<4x8x1xf32> -> vector<4x8x1xf32>
    %169 = vector.broadcast %168 : vector<4x8x1xf32> to vector<4x8x8xf32>
    %170 = arith.mulf %165, %169 : vector<4x8x8xf32>
    "tpu.trace_start"() <{level = 10 : i32, message = "hqk,hkd->hqd"}> : () -> ()
    %cst_52 = arith.constant dense<0.000000e+00> : vector<4x8x8xf32>
    %171 = tpu.matmul %170, %156, %cst_52 {dimension_numbers = #tpu.dot_dimension_numbers<[2], [1], [1], [2], [0, 0, 0, 1, 1, 2], [0], [0]>} : vector<4x8x8xf32>, vector<4x8x8xf32>, vector<4x8x8xf32> -> vector<4x8x8xf32>
    "tpu.trace_stop"() : () -> ()
    %172 = tpu.transpose %171, [0, 2, 1] : vector<4x8x8xf32> -> vector<4x8x8xf32>
    %173 = vector.shape_cast %172 : vector<4x8x8xf32> to vector<32x8xf32>
    %174 = tpu.transpose %173, [1, 0] : vector<32x8xf32> -> vector<8x32xf32>
    %c344 = arith.constant 344 : index
    %c0_53 = arith.constant 0 : index
    %175 = vector.load %arg2[%c344, %c0_53] : memref<632x128xf32, #tpu.memory_space<vmem>>, vector<32x32xf32>
    %cst_54 = arith.constant dense<0.000000e+00> : vector<8x32xf32>
    %176 = tpu.matmul %174, %175, %cst_54 {dimension_numbers = #tpu.dot_dimension_numbers<[1], [0], [0], [1], [0, 0, 1, 1], [], []>} : vector<8x32xf32>, vector<32x32xf32>, vector<8x32xf32> -> vector<8x32xf32>
    %177 = arith.addf %115, %176 : vector<8x32xf32>
    %c376 = arith.constant 376 : index
    %c0_55 = arith.constant 0 : index
    %178 = vector.load %arg2[%c376, %c0_55] : memref<632x128xf32, #tpu.memory_space<vmem>>, vector<1x32xf32>
    %179 = vector.broadcast %178 : vector<1x32xf32> to vector<8x32xf32>
    %180 = arith.addf %177, %179 : vector<8x32xf32>
    %c384 = arith.constant 384 : index
    %c0_56 = arith.constant 0 : index
    %181 = vector.load %arg2[%c384, %c0_56] : memref<632x128xf32, #tpu.memory_space<vmem>>, vector<1x32xf32>
    %c392 = arith.constant 392 : index
    %c0_57 = arith.constant 0 : index
    %182 = vector.load %arg2[%c392, %c0_57] : memref<632x128xf32, #tpu.memory_space<vmem>>, vector<1x32xf32>
    %cst_58 = arith.constant dense<0.000000e+00> : vector<8xf32>
    %183 = vector.multi_reduction <add>, %180, %cst_58 [1] : vector<8x32xf32> to vector<8xf32>
    %184 = vector.shape_cast %183 : vector<8xf32> to vector<8x1xf32>
    %cst_59 = arith.constant 3.200000e+01 : f32
    %185 = vector.broadcast %cst_59 : f32 to vector<8x1xf32>
    %186 = arith.divf %184, %185 : vector<8x1xf32>
    %187 = vector.broadcast %186 : vector<8x1xf32> to vector<8x32xf32>
    %188 = arith.subf %180, %187 : vector<8x32xf32>
    %189 = arith.mulf %188, %188 : vector<8x32xf32>
    %cst_60 = arith.constant dense<0.000000e+00> : vector<8xf32>
    %190 = vector.multi_reduction <add>, %189, %cst_60 [1] : vector<8x32xf32> to vector<8xf32>
    %191 = vector.shape_cast %190 : vector<8xf32> to vector<8x1xf32>
    %cst_61 = arith.constant 3.200000e+01 : f32
    %192 = vector.broadcast %cst_61 : f32 to vector<8x1xf32>
    %193 = arith.divf %191, %192 : vector<8x1xf32>
    %194 = vector.broadcast %186 : vector<8x1xf32> to vector<8x32xf32>
    %195 = arith.subf %180, %194 : vector<8x32xf32>
    %cst_62 = arith.constant 9.99999974E-6 : f32
    %196 = vector.broadcast %cst_62 : f32 to vector<8x1xf32>
    %197 = arith.addf %193, %196 : vector<8x1xf32>
    %198 = math.rsqrt %197 : vector<8x1xf32>
    %199 = vector.broadcast %198 : vector<8x1xf32> to vector<8x32xf32>
    %200 = arith.mulf %195, %199 : vector<8x32xf32>
    %201 = vector.broadcast %181 : vector<1x32xf32> to vector<8x32xf32>
    %202 = arith.mulf %200, %201 : vector<8x32xf32>
    %203 = vector.broadcast %182 : vector<1x32xf32> to vector<8x32xf32>
    %204 = arith.addf %202, %203 : vector<8x32xf32>
    %c400 = arith.constant 400 : index
    %c0_63 = arith.constant 0 : index
    %205 = vector.load %arg2[%c400, %c0_63] : memref<632x128xf32, #tpu.memory_space<vmem>>, vector<32x128xf32>
    %cst_64 = arith.constant dense<0.000000e+00> : vector<8x128xf32>
    %206 = tpu.matmul %204, %205, %cst_64 {dimension_numbers = #tpu.dot_dimension_numbers<[1], [0], [0], [1], [0, 0, 1, 1], [], []>} : vector<8x32xf32>, vector<32x128xf32>, vector<8x128xf32> -> vector<8x128xf32>
    %c432 = arith.constant 432 : index
    %c0_65 = arith.constant 0 : index
    %207 = vector.load %arg2[%c432, %c0_65] : memref<632x128xf32, #tpu.memory_space<vmem>>, vector<1x128xf32>
    %208 = vector.broadcast %207 : vector<1x128xf32> to vector<8x128xf32>
    %209 = arith.addf %206, %208 : vector<8x128xf32>
    %cst_66 = arith.constant 5.000000e-01 : f32
    %210 = vector.broadcast %cst_66 : f32 to vector<8x128xf32>
    %211 = arith.mulf %210, %209 : vector<8x128xf32>
    %cst_67 = arith.constant 0.707106769 : f32
    %212 = vector.broadcast %cst_67 : f32 to vector<8x128xf32>
    %213 = arith.mulf %209, %212 : vector<8x128xf32>
    %214 = math.erf %213 : vector<8x128xf32>
    %cst_68 = arith.constant 1.000000e+00 : f32
    %215 = vector.broadcast %cst_68 : f32 to vector<8x128xf32>
    %216 = arith.addf %215, %214 : vector<8x128xf32>
    %217 = arith.mulf %211, %216 : vector<8x128xf32>
    %c440 = arith.constant 440 : index
    %c0_69 = arith.constant 0 : index
    %218 = vector.load %arg2[%c440, %c0_69] : memref<632x128xf32, #tpu.memory_space<vmem>>, vector<128x32xf32>
    %cst_70 = arith.constant dense<0.000000e+00> : vector<8x32xf32>
    %219 = tpu.matmul %217, %218, %cst_70 {dimension_numbers = #tpu.dot_dimension_numbers<[1], [0], [0], [1], [0, 0, 1, 1], [], []>} : vector<8x128xf32>, vector<128x32xf32>, vector<8x32xf32> -> vector<8x32xf32>
    %220 = arith.addf %180, %219 : vector<8x32xf32>
    %c568 = arith.constant 568 : index
    %c0_71 = arith.constant 0 : index
    %221 = vector.load %arg2[%c568, %c0_71] : memref<632x128xf32, #tpu.memory_space<vmem>>, vector<1x32xf32>
    %222 = vector.broadcast %221 : vector<1x32xf32> to vector<8x32xf32>
    %223 = arith.addf %220, %222 : vector<8x32xf32>
    %c576 = arith.constant 576 : index
    %c0_72 = arith.constant 0 : index
    %224 = vector.load %arg2[%c576, %c0_72] : memref<632x128xf32, #tpu.memory_space<vmem>>, vector<1x32xf32>
    %c584 = arith.constant 584 : index
    %c0_73 = arith.constant 0 : index
    %225 = vector.load %arg2[%c584, %c0_73] : memref<632x128xf32, #tpu.memory_space<vmem>>, vector<1x32xf32>
    %cst_74 = arith.constant dense<0.000000e+00> : vector<8xf32>
    %226 = vector.multi_reduction <add>, %223, %cst_74 [1] : vector<8x32xf32> to vector<8xf32>
    %227 = vector.shape_cast %226 : vector<8xf32> to vector<8x1xf32>
    %cst_75 = arith.constant 3.200000e+01 : f32
    %228 = vector.broadcast %cst_75 : f32 to vector<8x1xf32>
    %229 = arith.divf %227, %228 : vector<8x1xf32>
    %230 = vector.broadcast %229 : vector<8x1xf32> to vector<8x32xf32>
    %231 = arith.subf %223, %230 : vector<8x32xf32>
    %232 = arith.mulf %231, %231 : vector<8x32xf32>
    %cst_76 = arith.constant dense<0.000000e+00> : vector<8xf32>
    %233 = vector.multi_reduction <add>, %232, %cst_76 [1] : vector<8x32xf32> to vector<8xf32>
    %234 = vector.shape_cast %233 : vector<8xf32> to vector<8x1xf32>
    %cst_77 = arith.constant 3.200000e+01 : f32
    %235 = vector.broadcast %cst_77 : f32 to vector<8x1xf32>
    %236 = arith.divf %234, %235 : vector<8x1xf32>
    %237 = vector.broadcast %229 : vector<8x1xf32> to vector<8x32xf32>
    %238 = arith.subf %223, %237 : vector<8x32xf32>
    %cst_78 = arith.constant 9.99999974E-6 : f32
    %239 = vector.broadcast %cst_78 : f32 to vector<8x1xf32>
    %240 = arith.addf %236, %239 : vector<8x1xf32>
    %241 = math.rsqrt %240 : vector<8x1xf32>
    %242 = vector.broadcast %241 : vector<8x1xf32> to vector<8x32xf32>
    %243 = arith.mulf %238, %242 : vector<8x32xf32>
    %244 = vector.broadcast %224 : vector<1x32xf32> to vector<8x32xf32>
    %245 = arith.mulf %243, %244 : vector<8x32xf32>
    %246 = vector.broadcast %225 : vector<1x32xf32> to vector<8x32xf32>
    %247 = arith.addf %245, %246 : vector<8x32xf32>
    %c592 = arith.constant 592 : index
    %c0_79 = arith.constant 0 : index
    %248 = vector.load %arg2[%c592, %c0_79] : memref<632x128xf32, #tpu.memory_space<vmem>>, vector<32x128xf32>
    %cst_80 = arith.constant dense<0.000000e+00> : vector<8x128xf32>
    %249 = tpu.matmul %247, %248, %cst_80 {dimension_numbers = #tpu.dot_dimension_numbers<[1], [0], [0], [1], [0, 0, 1, 1], [], []>} : vector<8x32xf32>, vector<32x128xf32>, vector<8x128xf32> -> vector<8x128xf32>
    %c624 = arith.constant 624 : index
    %c0_81 = arith.constant 0 : index
    %250 = vector.load %arg2[%c624, %c0_81] : memref<632x128xf32, #tpu.memory_space<vmem>>, vector<1x128xf32>
    %251 = vector.broadcast %250 : vector<1x128xf32> to vector<8x128xf32>
    %252 = arith.addf %249, %251 : vector<8x128xf32>
    %c0_82 = arith.constant 0 : index
    %c0_83 = arith.constant 0 : index
    %c0_84 = arith.constant 0 : index
    %253 = vector.load %arg3[%c0_82, %c0_83, %c0_84] : memref<1x8x128xf32, #tpu.memory_space<vmem>>, vector<1x8x128xf32>
    %254 = vector.shape_cast %253 : vector<1x8x128xf32> to vector<8x128xf32>
    %255 = vector.shape_cast %252 : vector<8x128xf32> to vector<1x8x128xf32>
    tpu.vector_store %arg3[%c0_82, %c0_83, %c0_84], %255 {strides = array<i32>} : memref<1x8x128xf32, #tpu.memory_space<vmem>>, vector<1x8x128xf32>,
    return
  }
  func.func @transform_0(%arg0: i32) -> (i32, i32, i32) {
    %c0_i32 = arith.constant 0 : i32
    %c0_i32_0 = arith.constant 0 : i32
    %c0_i32_1 = arith.constant 0 : i32
    return %arg0, %c0_i32, %c0_i32_0 : i32, i32, i32
  }
  func.func @transform_1(%arg0: i32) -> (i32, i32) {
    %c0_i32 = arith.constant 0 : i32
    %c0_i32_0 = arith.constant 0 : i32
    %c0_i32_1 = arith.constant 0 : i32
    return %c0_i32, %c0_i32_0 : i32, i32
  }
  func.func @transform_2(%arg0: i32) -> (i32, i32, i32) {
    %c0_i32 = arith.constant 0 : i32
    %c0_i32_0 = arith.constant 0 : i32
    %c0_i32_1 = arith.constant 0 : i32
    return %arg0, %c0_i32, %c0_i32_0 : i32, i32, i32
  }
}

</mosaic_0001>

<bundles_post_ra>
// kernel: tpu_custom_call.1
= control target key start
LH: loop header
LB: loop body
LE: loop exit
PB: predicated region body
PF: predicated region fallthrough
CT: control target
= control target key end

     0   :  { %7 = vsyncpa [#allocation3], 0  ;;  %s2508_s0 = inlined_call_operand.hbm [shape: f32[2,8,32], index: 0, kind: input, shape index: {}]   ;;  %s2509_s1 = inlined_call_operand.hbm [shape: f32[632,128], index: 1, kind: input, shape index: {}]   ;;  %s2510_s2 = inlined_call_operand.hbm [shape: f32[2,8,128], index: 2, kind: output, shape index: {}]  }
   0x1   :  { %9 = vsyncpa [#allocation3 + $0x1], 0 }
   0x2   :  { %10 = vsyncpa [#allocation6], 0 }
   0x3   :  { %11 = vsyncpa [#allocation4], 0 }
   0x4   :  { %13 = vsyncpa [#allocation4 + $0x1], 0  ;;  %s2261_s9 = smov 0   ;;  %s2263_s10 = smov 0  }
   0x5   :  { %s2265_s11 = smov 0   ;;  %s2267_s12 = smov 0  }
   0x6 LB: > { %s108_s15 = sshll.u32 %s2509_s1, 4  ;;  %s2285_s16 = sadd.s32 4294967295, %s2239_s12   ;;  %s2239_s12 = sphi %s2267_s12, %s2520_s12   ;;  %s2235_s11 = sphi %s2265_s11, %s2519_s11   ;;  %s2231_s10 = sphi %s2263_s10, %s2518_s10   ;;  %s2227_s9 = sphi %s2261_s9, %s2517_s9   ;;  %s109_s15 = int_to_ptr.hbm [resolvable:$true] %s108_s15 }
   0x7   : > { %p1935_p0 = scmp.ge.s32.totalorder %s2239_s12, 1  ;;  %p40_p1 = scmp.eq.s32.totalorder %s2285_s16, 0 }
   0x8   : > { %p97_p2 = scmp.lt.s32.totalorder %s2239_s12, 3  ;;  %s2241_s18 = smov [#allocation5]  }
   0x9   : > { %s110_s19 = sshll.u32 %s2241_s18, 4  ;;  %s2242_s20 = smov 128   ;;  %s111_s19 = int_to_ptr.vmem [resolvable:$true] %s110_s19 }
   0xa   : > { %p2290_p3 = pnand %p1935_p0, %p97_p2  ;;  %s2243_s21 = smov 8  }
   0xb   : > { %s1934_s22 = sadd.s32 4294967294, %s2239_s12   ;;  %s2301_s23 = sadd.s32 1, %s2239_s12  }
   0xc   : > { %p1989_p4 = pneg %p2290_p3  ;;  %s26_s24 = sadd.s32 1, %s2235_s11 }
   0xd   : > { %s23_s25 = ssub.s32 %s2239_s12, %s2301_s23  ;;  %p33_p7 = scmp.ne.s32.totalorder %s2235_s11, %s2231_s10 }
   0xe   : > { %p1990_p6 = pnand %p1989_p4, %p40_p1  ;;  %p24_p8 = scmp.eq.s32.totalorder %s23_s25, 0 }
   0xf   : > { %p34_p9 = scmp.eq.s32.totalorder %s2239_s12, 0  ;;  %p39_p10 = scmp.ne.s32.totalorder %s2231_s10, %s2227_s9 }
  0x10   : > { %1992 = dma.hbm_to_vmem [thread:$0]  (!%p1990_p6), %s109_s15, 10112, %s111_s19, [#allocation6], %s2242_s20, %s2242_s20, %s2243_s21  }
  0x11   : > { %p84_p11 = scmp.eq.s32.totalorder %s2285_s16, 1  ;;  %p2317_p12 = por %p40_p1, %p39_p10 }
  0x12   : > { %s2313_s26 = scalar_select %p24_p8, %s2235_s11, %s26_s24  }
  0x13   : > { %p2321_p13 = por %p84_p11, %p33_p7  ;;  %p90_p0 = scmp.eq.s32.totalorder %s1934_s22, 1 }
  0x14   : > { %p35_p2 = por %p34_p9, %p33_p7  ;;  %s124_s29 = sand.u32 1, %s2235_s11  }
  0x15   : > { %p2326_p4 = por %p90_p0, %p39_p10  ;;  %p2002_p6 = scmp.lt.s32.totalorder %s2239_s12, 2 }
  0x16   : > { %s1938_s3 = sshll.u32 %s124_s29, 3  ;;  %s1939_s4 = sshll.u32 %s2239_s12, 3 }
  0x17   : > { %s132_s7 = scalar_lea.hbm %s2508_s0, %s1939_s4  ;;  %s128_s13 = scalar_lea.vmem [#allocation2], %s1938_s3 }
  0x18   : > { %s134_s8 = sshll.u32 %s132_s7, 4  ;;  %s136_s14 = sshll.u32 %s128_s13, 4  ;;  %s135_s8 = int_to_ptr.hbm [resolvable:$true] %s134_s8  ;;  %s137_s14 = int_to_ptr.vmem [resolvable:$true] %s136_s14 }
  0x19   : > { %p2335_p8 = pnand %p2002_p6, %p35_p2  ;;  %s125_s18 = scalar_lea.sflag [#allocation3], %s124_s29 }
  0x1a   : > { %s2139_s19 = sshra.s32 %s135_s8, 4  ;;  %s2146_s24 = scalar_lea.hbm %s2508_s0, 16  ;;  %s2140_s19 = int_to_ptr.hbm [resolvable:$true] %s2139_s19 }
  0x1b   : > { %s2141_s20 = scalar_lea.hbm %s2140_s19, 8  ;;  %p2143_p9 = pneg %p2335_p8 }
  0x1c   : > { %p2142_p7 = scmp.ne.s32.totalorder %s2140_s19, %s2141_s20  ;;  %p2147_p0 = scmp.lt.s32.totalorder %s2140_s19, %s2508_s0 }
  0x1d   : > { %p2148_p2 = scmp.lt.s32.totalorder %s2146_s24, %s2141_s20 }
  0x1e   : > { %p2144_p10 = pnand %p2143_p9, %p2142_p7 }
  0x1f   : > { %p2149_p6 = por %p2148_p2, %p2147_p0 }
  0x20   : > { %p2145_p11 = pneg %p2144_p10 }
  0x22   : > { %p2150_p5 = pnand %p2149_p6, %p2145_p11 }
  0x24   : > { %2153 = shalt.err (!%p2150_p5)
}
  0x25   : > { %1996 = dma.hbm_to_vmem [thread:$0]  (!%p2335_p8), %s135_s8, 128, %s137_s14, %s125_s18  }
  0x26   : > { %145 = sbr.rel (%p2290_p3) target bundleno = 5006 (0x138e), region = 28  ;;  %s2352_s29 = sand.u32 (!%p2290_p3), 1, %s2231_s10  }
  0x27   : > { %s1941_s4 = sshll.u32 (!%p2290_p3), %s2352_s29, 3  ;;  %s148_s5 = scalar_lea.sflag (!%p2290_p3), [#allocation3], %s2352_s29 }
  0x28   : > { %s151_s6 = scalar_lea.vmem (!%p2290_p3), [#allocation2], %s1941_s4 }
  0x2b   : > { %2214 = dma.done.wait (%p2317_p12), %s148_s5, 128  }
  0x2c   : > { %2216 = vsyncadd (%p2317_p12), %s148_s5, 4294967168 }
  0x2d   : > { %2218 = dma.done.wait (%p40_p1), [#allocation6], 10112  }
  0x2e   : > { %2220 = vsyncadd (%p40_p1), [#allocation6], 4294957184  ;;  %vm187_vm0 = vcmask 261120   ;;  %v2366_v0 = vld [vmem:[%s151_s6] sm:$0xff]  ;;  %v2244_v2 = vmov 32.0   ;;  %v224_v14 = vld [vmem:[#allocation5 + $0x28] sm:$0xff]  ;;  %v179_v56 = vlaneseq }
  0x2f   : > { %v188_v1 = vsel %vm187_vm0, %v2366_v0, 0.0  ;;  %2061 = vrcp.f32 %v2244_v2  ;;  %242 = vmatpush.msra.mxu0 %v224_v14  ;;  %v223_v15 = vld [vmem:[#allocation5 + $0x20] sm:$0xff]  ;;  %v222_v16 = vld [vmem:[#allocation5 + $0x18] sm:$0xff]  ;;  %v221_v17 = vld [vmem:[#allocation5 + $0x10] sm:$0xff]  ;;  %vm414_vm5 = vcmask 64512   ;;  %v2245_v59 = vmov 0.0  }
  0x30   : > { %189 = vadd.xlane.f32.xlu0 %v188_v1  ;;  %v2042_v27 = vld [vmem:[#allocation5] ss:$0 sm:$0xff]  ;;  %v2043_v30 = vld [vmem:[#allocation5 + $0x8] ss:$0 sm:$0xff]  ;;  %v2044_v33 = vld [vmem:[#allocation5 + $0x30] ss:$0 sm:$0xff] }
  0x31   : > { %243 = vmatpush.msra.mxu0 %v223_v15  ;;  %v180_v57 = vshrl.u32 %v179_v56, 7  ;;  %v182_v58 = vand.u32 127, %v179_v56  ;;  %v2045_v56 = vld [vmem:[#allocation5 + $0x58] ss:$0 sm:$0xff]  ;;  %s1978_s17 = sshll.u32 %s2285_s16, 3  ;;  %s177_s13 = scalar_lea.vmem [#allocation7], %s1941_s4 }
  0x32   : > { %s1849_s8 = scalar_lea.hbm %s2510_s2, %s1978_s17  ;;  %s1851_s14 = sshll.u32 %s177_s13, 4  ;;  %s1852_s14 = int_to_ptr.vmem [resolvable:$true] %s1851_s14 }
  0x33   : > { %244 = vmatpush.msra.mxu0 %v222_v16  ;;  %vm183_vm6 = vcmp.gt.s32.totalorder %v182_v58, %v180_v57  ;;  %s1853_s15 = sshll.u32 %s1849_s8, 4  ;;  %s1839_s18 = scalar_lea.sflag [#allocation4], %s2352_s29  ;;  %s1854_s15 = int_to_ptr.hbm [resolvable:$true] %s1853_s15 }
  0x34   : > { %v2385_v60 = vsel %vm183_vm6, -1e+30, %v2245_v59  ;;  %s2183_s19 = sshra.s32 %s1854_s15, 4  ;;  %s2189_s22 = scalar_lea.hbm %s2510_s2, 16  ;;  %s2184_s19 = int_to_ptr.hbm [resolvable:$true] %s2183_s19 }
  0x35   : > { %v2062_v3 = vpop.eup %2061  ;;  %245 = vmatpush.msra.mxu0 %v221_v17  ;;  %s2185_s20 = scalar_lea.hbm %s2184_s19, 8  ;;  %p2190_p12 = scmp.lt.s32.totalorder %s2184_s19, %s2510_s2 }
  0x36   : > { %v192_v4 = vmul.f32 32.0, %v2062_v3  ;;  %vm196_vm1 = vweird.f32 %v2062_v3  ;;  %p2186_p1 = scmp.ne.s32.totalorder %s2184_s19, %s2185_s20  ;;  %p2191_p8 = scmp.lt.s32.totalorder %s2189_s22, %s2185_s20 }
  0x38   : > { %v193_v5 = vsub.f32 1.0, %v192_v4  ;;  %p2187_p3 = pnand %p2186_p1, %p2321_p13  ;;  %p2192_p7 = por %p2191_p8, %p2190_p12 }
  0x3a   : > { %v194_v6 = vmul.f32 %v2062_v3, %v193_v5  ;;  %p2188_p5 = pneg %p2187_p3 }
  0x3c   : > { %v195_v7 = vadd.f32 %v2062_v3, %v194_v6  ;;  %p2193_p9 = pnand %p2192_p7, %p2188_p5 }
  0x3e   : > { %v2370_v8 = vsel %vm196_vm1, %v2062_v3, %v195_v7 }
  0xa3   : > { %v190_v9 = vpop.xlane.xlu0 %189 }
  0xa4   : > { %v198_v10 = vmul.f32 %v2370_v8, %v190_v9 }
  0xa6   : > { %v199_v11 = vsub.f32 %v2366_v0, %v198_v10 }
  0xa8   : > { %v200_v12 = vmul.f32 %v199_v11, %v199_v11 }
  0xaa   : > { %v201_v13 = vsel %vm187_vm0, %v200_v12, 0.0 }
  0xab   : > { %202 = vadd.xlane.f32.xlu0 %v201_v13 }
 0x11e   : > { %v203_v18 = vpop.xlane.xlu0 %202 }
 0x11f   : > { %v204_v19 = vmul.f32 %v203_v18, %v2370_v8 }
 0x121   : > { %v205_v20 = vadd.f32 1e-05, %v204_v19 }
 0x123   : > { %2063 = vrsqrt.f32 %v205_v20  ;;  %vm212_vm3 = vweird.f32 %v205_v20 }
 0x129   : > { %v2064_v21 = vpop.eup %2063 }
 0x12a   : > { %v207_v22 = vmul.f32 %v2064_v21, %v205_v20  ;;  %vm213_vm2 = vweird.f32 %v2064_v21 }
 0x12b   : > { %vm214_vm4 = vmor %vm212_vm3, %vm213_vm2 }
 0x12c   : > { %v208_v23 = vmul.f32 %v2064_v21, %v207_v22 }
 0x12e   : > { %v209_v24 = vmul.f32 0.5, %v208_v23 }
 0x130   : > { %v210_v25 = vsub.f32 1.5, %v209_v24 }
 0x132   : > { %v211_v26 = vmul.f32 %v2064_v21, %v210_v25 }
 0x134   : > { %v215_v28 = vsel %vm214_vm4, %v2064_v21, %v211_v26 }
 0x135   : > { %v216_v29 = vmul.f32 %v215_v28, %v199_v11 }
 0x137   : > { %v218_v31 = vmul.f32 %v2042_v27, %v216_v29 }
 0x139   : > { %v220_v32 = vadd.f32 %v2043_v30, %v218_v31 }
 0x13b   : > { %1944 = vmatmul.msk.f32.vlgmr.msra.gmra.mxu0 %vm187_vm0, %v220_v32 }
 0x1b8   : > { %v247_v34 = vpop.f32.mrf.mxu0 }
 0x1b9   : > { %v248_v35 = vadd.f32 %v2044_v33, %v247_v34 }
 0x1bb   : > { %250 = vxpose.xlu1.b32.start.end [1/1] (short) (narrow) %v248_v35, 96 }
 0x25f   : > { %v266_v36 = vpop.trf.xlu1 }
 0x260   : > { %282 = vxpose.xlu1.b32.start.end [1/1] (short) (narrow) %v266_v36, 8 }
 0x267   : > { %v267_v37 = vpop.trf.xlu1 }
 0x268   : > { %314 = vxpose.xlu2.b32.start.end [1/1] (short) (narrow) %v267_v37, 8 }
 0x26f   : > { %v268_v38 = vpop.trf.xlu1 }
 0x270   : > { %346 = vxpose.xlu2.b32.start.end [1/1] (short) (narrow) %v268_v38, 8 }
 0x277   : > { %v269_v39 = vpop.trf.xlu1 }
 0x278   : > { %378 = vxpose.xlu0.b32.start.end [1/1] (short) (narrow) %v269_v39, 8 }
 0x27f   : > { %v270_v40 = vpop.trf.xlu1 }
 0x280   : > { %433 = vmatpush.msra.mxu1 %v270_v40 }
 0x287   : > { %v271_v41 = vpop.trf.xlu1 }
 0x288   : > { %456 = vmatpush.msra.mxu2 %v271_v41 }
 0x28f   : > { %v272_v42 = vpop.trf.xlu1 }
 0x290   : > { %479 = vmatpush.msra.mxu3 %v272_v42 }
 0x297   : > { %v273_v43 = vpop.trf.xlu1 }
 0x298   : > { %502 = vmatpush.msrb.mxu1 %v273_v43 }
 0x29f   : > { %v274_v44 = vpop.trf.xlu1 }
 0x2a0   : > { %1949 = vmatpush.xpose.msk.msrb.mxu2 %vm414_vm5, %v274_v44 }
 0x2a7   : > { %v275_v45 = vpop.trf.xlu1 }
 0x2af   : > { %v276_v46 = vpop.trf.xlu1 }
 0x2b0   : > { %1953 = vmatpush.xpose.msk.msrb.mxu0 %vm414_vm5, %v276_v46 }
 0x2b7   : > { %v277_v47 = vpop.trf.xlu1 }
 0x301   : > { %v330_v48 = vpop.trf.xlu2 }
 0x302   : > { %v411_v49 = vmul.f32 0.35355338, %v330_v48  ;;  %v817_v48 = vld [vmem:[#allocation5 + $0x48] sm:$0xff] }
 0x304   : > { %1946 = vmatmul.msk.f32.vlgmr.msra.gmra.mxu2 %vm414_vm5, %v411_v49  ;;  %v298_v50 = vpop.trf.xlu1 }
 0x305   : > { %v410_v51 = vmul.f32 0.35355338, %v298_v50  ;;  %v816_v50 = vld [vmem:[#allocation5 + $0x40] sm:$0xff] }
 0x307   : > { %1945 = vmatmul.msk.f32.vlgmr.msra.gmra.mxu1 %vm414_vm5, %v410_v51  ;;  %v815_v51 = vld [vmem:[#allocation5 + $0x38] sm:$0xff] }
 0x308   : > { %1951 = vmatpush.xpose.msk.msra.mxu1 %vm414_vm5, %v275_v45 }
 0x309   : > { %v362_v52 = vpop.trf.xlu2 }
 0x30a   : > { %v412_v53 = vmul.f32 0.35355338, %v362_v52 }
 0x30c   : > { %1947 = vmatmul.msk.f32.vlgmr.msra.gmra.mxu3 %vm414_vm5, %v412_v53 }
 0x31c   : > { %v394_v54 = vpop.trf.xlu0 }
 0x31d   : > { %v413_v55 = vmul.f32 0.35355338, %v394_v54 }
 0x31f   : > { %1948 = vmatmul.msk.f32.vlgmr.msrb.gmra.mxu1 %vm414_vm5, %v413_v55 }
 0x320   : > { %1955 = vmatpush.xpose.msk.msrb.mxu1 %vm414_vm5, %v277_v47  ;;  %v818_v47 = vld [vmem:[#allocation5 + $0x50] sm:$0xff] }
 0x321   : > { %834 = vmatpush.msra.mxu2 %v818_v47 }
 0x323   : > { %835 = vmatpush.msra.mxu2 %v817_v48  ;;  %v950_v48 = vld [vmem:[#allocation5 + $0xb0] sm:$0xff] }
 0x325   : > { %836 = vmatpush.msra.mxu2 %v816_v50 }
 0x327   : > { %837 = vmatpush.msra.mxu2 %v815_v51  ;;  %v949_v51 = vld [vmem:[#allocation5 + $0xa8] sm:$0xff] }
 0x384   : > { %v435_v61 = vpop.f32.mrf.mxu1 }
 0x385   : > { %v436_v62 = vadd.f32 %v435_v61, %v2385_v60 }
 0x387   : > { %v458_v63 = vpop.f32.mrf.mxu2  ;;  %v507_v1 = vsel %vm414_vm5, %v436_v62, -inf }
 0x388   : > { %v459_v2 = vadd.f32 %v458_v63, %v2385_v60  ;;  %508 = vmax.xlane.f32.xlu2 %v507_v1 }
 0x38a   : > { %v510_v3 = vsel %vm414_vm5, %v459_v2, -inf }
 0x38b   : > { %511 = vmax.xlane.f32.xlu0 %v510_v3 }
 0x38f   : > { %v481_v4 = vpop.f32.mrf.mxu3 }
 0x390   : > { %v482_v5 = vadd.f32 %v481_v4, %v2385_v60  ;;  %v877_v4 = vld [vmem:[#allocation5 + $0x88] sm:$0xff] }
 0x392   : > { %v513_v6 = vsel %vm414_vm5, %v482_v5, -inf }
 0x393   : > { %514 = vmax.xlane.f32.xlu1 %v513_v6  ;;  %v874_v6 = vld [vmem:[#allocation5 + $0x70] sm:$0xff] }
 0x39c   : > { %v504_v7 = vpop.f32.mrf.mxu1 }
 0x39d   : > { %v505_v9 = vadd.f32 %v504_v7, %v2385_v60 }
 0x39f   : > { %v516_v10 = vsel %vm414_vm5, %v505_v9, -inf }
 0x3a0   : > { %517 = vmax.xlane.f32.xlu2 %v516_v10 }
 0x3fb   : > { %v509_v11 = vpop.xlane.xlu2 %508 }
 0x3fc   : > { %v519_v12 = vsub.f32 %v436_v62, %v509_v11 }
 0x3fe   : > { %v523_v13 = vmul.f32 1.442695, %v519_v12  ;;  %v512_v14 = vpop.xlane.xlu0 %511 }
 0x3ff   : > { %v520_v15 = vsub.f32 %v459_v2, %v512_v14 }
 0x400   : > { %2065 = vpow2.f32 %v523_v13 }
 0x401   : > { %v525_v16 = vmul.f32 1.442695, %v520_v15 }
 0x403   : > { %2067 = vpow2.f32 %v525_v16 }
 0x406   : > { %v2066_v17 = vpop.eup %2065  ;;  %v515_v18 = vpop.xlane.xlu1 %514 }
 0x407   : > { %v521_v19 = vsub.f32 %v482_v5, %v515_v18  ;;  %v531_v20 = vsel %vm414_vm5, %v2066_v17, 0.0  ;;  %v876_v5 = vld [vmem:[#allocation5 + $0x80] sm:$0xff] }
 0x408   : > { %532 = vadd.xlane.f32.xlu2 %v531_v20  ;;  %v2047_v20 = vld [vmem:[#allocation5 + $0x68] ss:$0 sm:$0xff] }
 0x409   : > { %v527_v21 = vmul.f32 1.442695, %v521_v19  ;;  %v2068_v22 = vpop.eup %2067 }
 0x40a   : > { %v534_v23 = vsel %vm414_vm5, %v2068_v22, 0.0 }
 0x40b   : > { %2069 = vpow2.f32 %v527_v21 }
 0x410   : > { %535 = vadd.xlane.f32.xlu2 %v534_v23  ;;  %v962_v23 = vld [vmem:[#allocation5 + $0x110] sm:$0xff] }
 0x411   : > { %v2070_v25 = vpop.eup %2069  ;;  %963 = vmatpush.msra.mxu0 %v962_v23 }
 0x412   : > { %v537_v28 = vsel %vm414_vm5, %v2070_v25, 0.0 }
 0x413   : > { %v518_v24 = vpop.xlane.xlu2 %517 }
 0x414   : > { %v522_v26 = vsub.f32 %v505_v9, %v518_v24  ;;  %v961_v24 = vld [vmem:[#allocation5 + $0x108] sm:$0xff] }
 0x415   : > { %964 = vmatpush.msra.mxu0 %v961_v24 }
 0x416   : > { %v529_v27 = vmul.f32 1.442695, %v522_v26  ;;  %v2048_v26 = vld [vmem:[#allocation5 + $0x90] ss:$0 sm:$0xff] }
 0x418   : > { %2071 = vpow2.f32 %v529_v27  ;;  %538 = vadd.xlane.f32.xlu2 %v537_v28  ;;  %v959_v27 = vld [vmem:[#allocation5 + $0xf8] sm:$0xff]  ;;  %v958_v28 = vld [vmem:[#allocation5 + $0xf0] sm:$0xff] }
 0x41e   : > { %v2072_v29 = vpop.eup %2071 }
 0x41f   : > { %v540_v30 = vsel %vm414_vm5, %v2072_v29, 0.0 }
 0x420   : > { %541 = vadd.xlane.f32.xlu2 %v540_v30 }
 0x47b   : > { %v533_v31 = vpop.xlane.xlu2 %532 }
 0x47c   : > { %2073 = vrcp.f32 %v533_v31  ;;  %v957_v31 = vld [vmem:[#allocation5 + $0xe8] sm:$0xff] }
 0x482   : > { %v2074_v32 = vpop.eup %2073 }
 0x483   : > { %v536_v33 = vpop.xlane.xlu2 %535  ;;  %v547_v34 = vmul.f32 %v2074_v32, %v2066_v17  ;;  %v2046_v17 = vld [vmem:[#allocation5 + $0x60] ss:$0 sm:$0xff] }
 0x484   : > { %2075 = vrcp.f32 %v536_v33  ;;  %v956_v33 = vld [vmem:[#allocation5 + $0xe0] sm:$0xff] }
 0x485   : > { %1950 = vmatmul.msk.f32.vlgmr.msrb.gmra.mxu2 %vm414_vm5, %v547_v34 }
 0x486   : > { %895 = vmatpush.msrb.mxu2 %v877_v4 }
 0x488   : > { %896 = vmatpush.msrb.mxu2 %v876_v5 }
 0x48a   : > { %v2076_v35 = vpop.eup %2075 }
 0x48b   : > { %v548_v36 = vmul.f32 %v2076_v35, %v2068_v22  ;;  %v539_v37 = vpop.xlane.xlu2 %538  ;;  %v955_v35 = vld [vmem:[#allocation5 + $0xd8] sm:$0xff] }
 0x48c   : > { %2077 = vrcp.f32 %v539_v37  ;;  %v954_v37 = vld [vmem:[#allocation5 + $0xd0] sm:$0xff] }
 0x48d   : > { %1952 = vmatmul.msk.f32.vlgmr.msra.gmra.mxu1 %vm414_vm5, %v548_v36 }
 0x492   : > { %v2078_v38 = vpop.eup %2077 }
 0x493   : > { %v542_v39 = vpop.xlane.xlu2 %541  ;;  %v549_v40 = vmul.f32 %v2078_v38, %v2070_v25  ;;  %v960_v25 = vld [vmem:[#allocation5 + $0x100] sm:$0xff] }
 0x494   : > { %2079 = vrcp.f32 %v542_v39  ;;  %965 = vmatpush.msra.mxu0 %v960_v25 }
 0x495   : > { %1954 = vmatmul.msk.f32.vlgmr.msrb.gmra.mxu0 %vm414_vm5, %v549_v40  ;;  %v953_v40 = vld [vmem:[#allocation5 + $0xc8] sm:$0xff] }
 0x496   : > { %966 = vmatpush.msra.mxu0 %v959_v27 }
 0x498   : > { %967 = vmatpush.msra.mxu0 %v958_v28 }
 0x49a   : > { %v2080_v41 = vpop.eup %2079  ;;  %968 = vmatpush.msra.mxu0 %v957_v31  ;;  %v1017_v31 = vld [vmem:[#allocation5 + $0x140] sm:$0xff] }
 0x49b   : > { %v550_v42 = vmul.f32 %v2080_v41, %v2072_v29 }
 0x49c   : > { %969 = vmatpush.msra.mxu0 %v956_v33 }
 0x49d   : > { %1956 = vmatmul.msk.f32.vlgmr.msrb.gmra.mxu1 %vm414_vm5, %v550_v42 }
 0x49e   : > { %970 = vmatpush.msra.mxu0 %v955_v35 }
 0x4a0   : > { %971 = vmatpush.msra.mxu0 %v954_v37 }
 0x4a2   : > { %972 = vmatpush.msra.mxu0 %v953_v40 }
 0x508   : > { %v574_v43 = vpop.f32.mrf.mxu2 }
 0x509   : > { %655 = vxpose.xlu2.b32.start.end [1/1] (short) (narrow) %v574_v43, 8  ;;  %v952_v43 = vld [vmem:[#allocation5 + $0xc0] sm:$0xff] }
 0x50a   : > { %v600_v44 = vpop.f32.mrf.mxu1  ;;  %973 = vmatpush.msra.mxu0 %v952_v43 }
 0x50b   : > { %687 = vxpose.xlu0.b32.start.end [1/1] (short) (narrow) %v600_v44, 8 }
 0x512   : > { %v626_v45 = vpop.f32.mrf.mxu0 }
 0x513   : > { %719 = vxpose.xlu1.b32.start.end [1/1] (short) (narrow) %v626_v45, 8 }
 0x51a   : > { %v652_v46 = vpop.f32.mrf.mxu1 }
 0x51b   : > { %751 = vxpose.xlu2.b32.start.end [1/1] (short) (narrow) %v652_v46, 8  ;;  %v951_v46 = vld [vmem:[#allocation5 + $0xb8] sm:$0xff] }
 0x51c   : > { %974 = vmatpush.msra.mxu0 %v951_v46 }
 0x51e   : > { %975 = vmatpush.msra.mxu0 %v950_v48  ;;  %v2052_v48 = vld [vmem:[#allocation5 + $0x150] ss:$0 sm:$0xff] }
 0x520   : > { %976 = vmatpush.msra.mxu0 %v949_v51 }
 0x5a2   : > { %v671_v49 = vpop.trf.xlu2 }
 0x5a3   : > { %783 = vxpose.xlu0.b32.start [1/4] (short) (narrow) %v671_v49, 8 }
 0x5af   : > { %v703_v52 = vpop.trf.xlu0 }
 0x5b0   : > { %784 = vxpose.xlu0.b32.cont [2/4] (short) (narrow) %v703_v52, 8 }
 0x5b4   : > { %v767_v54 = vpop.trf.xlu2 }
 0x5b7   : > { %v735_v53 = vpop.trf.xlu1 }
 0x5b8   : > { %785 = vxpose.xlu0.b32.cont [3/4] (short) (narrow) %v735_v53, 8  ;;  %v948_v53 = vld [vmem:[#allocation5 + $0xa0] sm:$0xff] }
 0x5b9   : > { %977 = vmatpush.msra.mxu0 %v948_v53 }
 0x5c0   : > { %786 = vxpose.xlu0.b32.end [4/4] (short) (narrow) %v767_v54, 8 }
 0x64c   : > { %v799_v55 = vpop.trf.xlu0 }
 0x64d   : > { %1957 = vmatmul.msk.f32.vlgmr.msra.gmra.mxu2 %vm187_vm0, %v799_v55  ;;  %v947_v55 = vld [vmem:[#allocation5 + $0x98] sm:$0xff] }
 0x64e   : > { %978 = vmatpush.msra.mxu0 %v947_v55 }
 0x6d0   : > { %v839_v57 = vpop.f32.mrf.mxu2 }
 0x6d1   : > { %v842_v58 = vadd.f32 %v839_v57, %v2366_v0  ;;  %v875_v0 = vld [vmem:[#allocation5 + $0x78] sm:$0xff] }
 0x6d2   : > { %897 = vmatpush.msrb.mxu2 %v875_v0 }
 0x6d3   : > { %v2405_v59 = vadd.f32 %v2045_v56, %v842_v58 }
 0x6d4   : > { %898 = vmatpush.msrb.mxu2 %v874_v6 }
 0x6d5   : > { %v848_v61 = vsel %vm187_vm0, %v2405_v59, 0.0 }
 0x6d6   : > { %849 = vadd.xlane.f32.xlu2 %v848_v61 }
 0x749   : > { %v850_v62 = vpop.xlane.xlu2 %849 }
 0x74a   : > { %v851_v63 = vmul.f32 %v850_v62, %v2370_v8 }
 0x74c   : > { %v852_v1 = vsub.f32 %v2405_v59, %v851_v63 }
 0x74e   : > { %v853_v2 = vmul.f32 %v852_v1, %v852_v1 }
 0x750   : > { %v854_v3 = vsel %vm187_vm0, %v853_v2, 0.0 }
 0x751   : > { %855 = vadd.xlane.f32.xlu0 %v854_v3 }
 0x7c4   : > { %v856_v7 = vpop.xlane.xlu0 %855 }
 0x7c5   : > { %v857_v9 = vmul.f32 %v856_v7, %v2370_v8 }
 0x7c7   : > { %v858_v10 = vadd.f32 1e-05, %v857_v9 }
 0x7c9   : > { %2081 = vrsqrt.f32 %v858_v10  ;;  %vm865_vm8 = vweird.f32 %v858_v10 }
 0x7cf   : > { %v2082_v11 = vpop.eup %2081 }
 0x7d0   : > { %v860_v12 = vmul.f32 %v2082_v11, %v858_v10  ;;  %vm866_vm7 = vweird.f32 %v2082_v11 }
 0x7d1   : > { %vm867_vm9 = vmor %vm865_vm8, %vm866_vm7 }
 0x7d2   : > { %v861_v13 = vmul.f32 %v2082_v11, %v860_v12 }
 0x7d4   : > { %v862_v14 = vmul.f32 0.5, %v861_v13 }
 0x7d6   : > { %v863_v15 = vsub.f32 1.5, %v862_v14 }
 0x7d8   : > { %v864_v16 = vmul.f32 %v2082_v11, %v863_v15 }
 0x7da   : > { %v868_v18 = vsel %vm867_vm9, %v2082_v11, %v864_v16 }
 0x7db   : > { %v869_v19 = vmul.f32 %v868_v18, %v852_v1 }
 0x7dd   : > { %v871_v21 = vmul.f32 %v2046_v17, %v869_v19 }
 0x7df   : > { %v873_v22 = vadd.f32 %v2047_v20, %v871_v21  ;;  %v2049_v20 = vld [vmem:[#allocation5 + $0x118] ss:$0 sm:$0xff] }
 0x7e1   : > { %1958 = vmatmul.msk.f32.vlgmr.msrb.gmra.mxu2 %vm187_vm0, %v873_v22 }
 0x864   : > { %v900_v29 = vpop.f32.mrf.mxu2 }
 0x865   : > { %v2414_v30 = vadd.f32 %v2048_v26, %v900_v29 }
 0x867   : > { %v904_v32 = vmul.f32 0.70710677, %v2414_v30  ;;  %v903_v17 = vmul.f32 0.5, %v2414_v30  ;;  %v1018_v30 = vld [vmem:[#allocation5 + $0x148] sm:$0xff] }
 0x868   : > { %1036 = vmatpush.msra.mxu1 %v1018_v30 }
 0x869   : > { %v905_v34 = vmul.f32 %v904_v32, %v904_v32 }
 0x86a   : > { %1037 = vmatpush.msra.mxu1 %v1017_v31 }
 0x86b   : > { %v906_v36 = vmin.f32 %v905_v34, 16.0 }
 0x86d   : > { %v907_v38 = vmul.f32 2.1237322e-06, %v906_v36  ;;  %v918_v39 = vmul.f32 3.8918573e-05, %v906_v36 }
 0x86f   : > { %v908_v41 = vadd.f32 0.00028619796, %v907_v38  ;;  %v919_v42 = vadd.f32 0.001143296, %v918_v39 }
 0x871   : > { %v909_v44 = vmul.f32 %v908_v41, %v906_v36  ;;  %v920_v45 = vmul.f32 %v919_v42, %v906_v36  ;;  %v2050_v42 = vld [vmem:[#allocation5 + $0x120] ss:$0 sm:$0xff] }
 0x873   : > { %v921_v47 = vadd.f32 0.014752088, %v920_v45  ;;  %v910_v49 = vadd.f32 0.0036580483, %v909_v44  ;;  %v2051_v45 = vld [vmem:[#allocation5 + $0x128] ss:$0 sm:$0xff] }
 0x875   : > { %v922_v50 = vmul.f32 %v921_v47, %v906_v36  ;;  %v911_v54 = vmul.f32 %v910_v49, %v906_v36 }
 0x877   : > { %v923_v52 = vadd.f32 0.112945676, %v922_v50  ;;  %v912_v58 = vadd.f32 0.05243302, %v911_v54 }
 0x879   : > { %v924_v56 = vmul.f32 %v923_v52, %v906_v36  ;;  %v913_v63 = vmul.f32 %v912_v58, %v906_v36 }
 0x87b   : > { %v925_v57 = vadd.f32 0.4994258, %v924_v56  ;;  %v914_v1 = vadd.f32 0.18741608, %v913_v63 }
 0x87d   : > { %v926_v61 = vmul.f32 %v925_v57, %v906_v36  ;;  %v915_v3 = vmul.f32 %v914_v1, %v906_v36 }
 0x87f   : > { %v927_v62 = vadd.f32 1.0, %v926_v61  ;;  %v916_v6 = vadd.f32 1.1283791, %v915_v3 }
 0x881   : > { %2083 = vrcp.f32 %v927_v62  ;;  %v939_v0 = vand.u32 2147483648, %v927_v62  ;;  %v937_v9 = vand.u32 2147483647, %v927_v62  ;;  %vm933_vm11 = vweird.f32 %v927_v62 }
 0x882   : > { %v917_v12 = vmul.f32 %v916_v6, %v904_v32  ;;  %v1015_v32 = vld [vmem:[#allocation5 + $0x130] sm:$0xff] }
 0x883   : > { %v940_v11 = vor.u32 1.1754944e-38, %v939_v0  ;;  %vm938_vm13 = vcmp.eq.f32.partialorder %v937_v9, 8.507059e+37 }
 0x887   : > { %v2084_v2 = vpop.eup %2083 }
 0x888   : > { %v929_v4 = vmul.f32 %v2084_v2, %v927_v62  ;;  %vm934_vm10 = vweird.f32 %v2084_v2 }
 0x889   : > { %vm935_vm12 = vmor %vm933_vm11, %vm934_vm10 }
 0x88a   : > { %v930_v5 = vsub.f32 1.0, %v929_v4 }
 0x88c   : > { %v931_v7 = vmul.f32 %v2084_v2, %v930_v5 }
 0x88e   : > { %v932_v10 = vadd.f32 %v2084_v2, %v931_v7 }
 0x890   : > { %v936_v13 = vsel %vm935_vm12, %v2084_v2, %v932_v10 }
 0x891   : > { %v941_v14 = vsel %vm938_vm13, %v940_v11, %v936_v13 }
 0x892   : > { %v942_v15 = vmul.f32 %v941_v14, %v917_v12 }
 0x894   : > { %v1959_v16 = vclamps-f32 %v942_v15, 1.0 }
 0x896   : > { %v945_v18 = vadd.f32 1.0, %v1959_v16 }
 0x898   : > { %v946_v19 = vmul.f32 %v945_v18, %v903_v17 }
 0x89a   : > { %979 = vmatmul.f32.vlgmr.msra.gmra.mxu0 %v946_v19 }
 0x917   : > { %v980_v21 = vpop.f32.mrf.mxu0 }
 0x918   : > { %v983_v22 = vadd.f32 %v980_v21, %v2405_v59  ;;  %v1016_v59 = vld [vmem:[#allocation5 + $0x138] sm:$0xff] }
 0x919   : > { %1038 = vmatpush.msra.mxu1 %v1016_v59 }
 0x91a   : > { %v2419_v23 = vadd.f32 %v2049_v20, %v983_v22 }
 0x91b   : > { %1039 = vmatpush.msra.mxu1 %v1015_v32 }
 0x91c   : > { %v989_v24 = vsel %vm187_vm0, %v2419_v23, 0.0 }
 0x91d   : > { %990 = vadd.xlane.f32.xlu1 %v989_v24 }
 0x990   : > { %v991_v25 = vpop.xlane.xlu1 %990 }
 0x991   : > { %v992_v26 = vmul.f32 %v991_v25, %v2370_v8 }
 0x993   : > { %v993_v27 = vsub.f32 %v2419_v23, %v992_v26 }
 0x995   : > { %v994_v28 = vmul.f32 %v993_v27, %v993_v27 }
 0x997   : > { %v995_v29 = vsel %vm187_vm0, %v994_v28, 0.0 }
 0x998   : > { %996 = vadd.xlane.f32.xlu2 %v995_v29 }
 0xa0b   : > { %v997_v33 = vpop.xlane.xlu2 %996 }
 0xa0c   : > { %v998_v34 = vmul.f32 %v997_v33, %v2370_v8 }
 0xa0e   : > { %v999_v35 = vadd.f32 1e-05, %v998_v34 }
 0xa10   : > { %2085 = vrsqrt.f32 %v999_v35  ;;  %vm1006_vm15 = vweird.f32 %v999_v35 }
 0xa16   : > { %v2086_v36 = vpop.eup %2085 }
 0xa17   : > { %v1001_v37 = vmul.f32 %v2086_v36, %v999_v35  ;;  %vm1007_vm14 = vweird.f32 %v2086_v36 }
 0xa18   : > { %vm1008_vm1 = vmor %vm1006_vm15, %vm1007_vm14 }
 0xa19   : > { %v1002_v38 = vmul.f32 %v2086_v36, %v1001_v37 }
 0xa1b   : > { %v1003_v39 = vmul.f32 0.5, %v1002_v38 }
 0xa1d   : > { %v1004_v40 = vsub.f32 1.5, %v1003_v39 }
 0xa1f   : > { %v1005_v41 = vmul.f32 %v2086_v36, %v1004_v40 }
 0xa21   : > { %v1009_v43 = vsel %vm1008_vm1, %v2086_v36, %v1005_v41 }
 0xa22   : > { %v1010_v44 = vmul.f32 %v1009_v43, %v993_v27 }
 0xa24   : > { %v1012_v46 = vmul.f32 %v2050_v42, %v1010_v44 }
 0xa26   : > { %v1014_v47 = vadd.f32 %v2051_v45, %v1012_v46 }
 0xa28   : > { %1960 = vmatmul.msk.f32.vlgmr.msra.gmra.mxu1 %vm187_vm0, %v1014_v47 }
 0xaa5   : > { %v1041_v49 = vpop.f32.mrf.mxu1 }
 0xaa6   : > { %v1042_v50 = vadd.f32 %v2052_v48, %v1041_v49 }
 0xaa8   : > { %1044 = vxpose.xlu2.b32.start.end [1/1] (short) (narrow) %v1042_v50, 96 }
 0xb41   : > { %v1060_v51 = vpop.trf.xlu2 }
 0xb42   : > { %1076 = vxpose.xlu1.b32.start.end [1/1] (short) (narrow) %v1060_v51, 8 }
 0xb49   : > { %v1061_v52 = vpop.trf.xlu2 }
 0xb4a   : > { %1108 = vxpose.xlu0.b32.start.end [1/1] (short) (narrow) %v1061_v52, 8 }
 0xb51   : > { %v1062_v53 = vpop.trf.xlu2 }
 0xb52   : > { %1140 = vxpose.xlu0.b32.start.end [1/1] (short) (narrow) %v1062_v53, 8 }
 0xb59   : > { %v1063_v54 = vpop.trf.xlu2 }
 0xb5a   : > { %1172 = vxpose.xlu2.b32.start.end [1/1] (short) (narrow) %v1063_v54, 8 }
 0xb61   : > { %v1064_v55 = vpop.trf.xlu2 }
 0xb62   : > { %1226 = vmatpush.msra.mxu2 %v1064_v55 }
 0xb69   : > { %v1065_v56 = vpop.trf.xlu2 }
 0xb6a   : > { %1249 = vmatpush.msrb.mxu3 %v1065_v56 }
 0xb71   : > { %v1066_v57 = vpop.trf.xlu2 }
 0xb72   : > { %1272 = vmatpush.msrb.mxu1 %v1066_v57  ;;  %v1611_v57 = vld [vmem:[#allocation5 + $0x170] sm:$0xff] }
 0xb79   : > { %v1067_v58 = vpop.trf.xlu2 }
 0xb7a   : > { %1295 = vmatpush.msrb.mxu2 %v1067_v58  ;;  %v1610_v58 = vld [vmem:[#allocation5 + $0x168] sm:$0xff] }
 0xb81   : > { %v1068_v61 = vpop.trf.xlu2 }
 0xb82   : > { %1965 = vmatpush.xpose.msk.msra.mxu3 %vm414_vm5, %v1068_v61  ;;  %v1609_v61 = vld [vmem:[#allocation5 + $0x160] sm:$0xff] }
 0xb89   : > { %v1069_v62 = vpop.trf.xlu2 }
 0xb8a   : > { %1967 = vmatpush.xpose.msk.msra.mxu1 %vm414_vm5, %v1069_v62  ;;  %v1608_v62 = vld [vmem:[#allocation5 + $0x158] sm:$0xff] }
 0xb91   : > { %v1070_v63 = vpop.trf.xlu2 }
 0xb99   : > { %v1071_v3 = vpop.trf.xlu2 }
 0xbe6   : > { %v1092_v1 = vpop.trf.xlu1 }
 0xbe7   : > { %v1204_v2 = vmul.f32 0.35355338, %v1092_v1 }
 0xbe9   : > { %1961 = vmatmul.msk.f32.vlgmr.msra.gmra.mxu2 %vm414_vm5, %v1204_v2 }
 0xbea   : > { %1969 = vmatpush.xpose.msk.msra.mxu2 %vm414_vm5, %v1070_v63 }
 0xbee   : > { %v1124_v4 = vpop.trf.xlu0 }
 0xbef   : > { %v1205_v5 = vmul.f32 0.35355338, %v1124_v4 }
 0xbf1   : > { %1962 = vmatmul.msk.f32.vlgmr.msrb.gmra.mxu3 %vm414_vm5, %v1205_v5  ;;  %v2053_v5 = vld [vmem:[#allocation5 + $0x178] ss:$0 sm:$0xff] }
 0xbf2   : > { %1971 = vmatpush.xpose.msk.msrb.mxu3 %vm414_vm5, %v1071_v3 }
 0xbf3   : > { %v1188_v0 = vpop.trf.xlu2 }
 0xbf4   : > { %v1207_v6 = vmul.f32 0.35355338, %v1188_v0 }
 0xbf6   : > { %v1156_v7 = vpop.trf.xlu0  ;;  %1964 = vmatmul.msk.f32.vlgmr.msrb.gmra.mxu2 %vm414_vm5, %v1207_v6 }
 0xbf7   : > { %v1206_v9 = vmul.f32 0.35355338, %v1156_v7 }
 0xbf9   : > { %1963 = vmatmul.msk.f32.vlgmr.msrb.gmra.mxu1 %vm414_vm5, %v1206_v9 }
 0xbfa   : > { %1627 = vmatpush.msrb.mxu1 %v1611_v57  ;;  %v1743_v57 = vld [vmem:[#allocation5 + $0x1d0] sm:$0xff] }
 0xbfc   : > { %1628 = vmatpush.msrb.mxu1 %v1610_v58 }
 0xbfe   : > { %1629 = vmatpush.msrb.mxu1 %v1609_v61 }
 0xc00   : > { %1630 = vmatpush.msrb.mxu1 %v1608_v62  ;;  %v1742_v62 = vld [vmem:[#allocation5 + $0x1c8] sm:$0xff] }
 0xc6c   : > { %v1228_v10 = vpop.f32.mrf.mxu2 }
 0xc6d   : > { %v1229_v11 = vadd.f32 %v1228_v10, %v2385_v60 }
 0xc6f   : > { %v1300_v12 = vsel %vm414_vm5, %v1229_v11, -inf }
 0xc70   : > { %1301 = vmax.xlane.f32.xlu0 %v1300_v12 }
 0xc74   : > { %v1251_v13 = vpop.f32.mrf.mxu3 }
 0xc75   : > { %v1252_v14 = vadd.f32 %v1251_v13, %v2385_v60 }
 0xc76   : > { %v1274_v15 = vpop.f32.mrf.mxu1 }
 0xc77   : > { %v1275_v16 = vadd.f32 %v1274_v15, %v2385_v60  ;;  %v1303_v17 = vsel %vm414_vm5, %v1252_v14, -inf  ;;  %v1670_v15 = vld [vmem:[#allocation5 + $0x1a8] sm:$0xff] }
 0xc78   : > { %1304 = vmax.xlane.f32.xlu2 %v1303_v17  ;;  %1688 = vmatpush.msrb.mxu2 %v1670_v15  ;;  %v1667_v17 = vld [vmem:[#allocation5 + $0x190] sm:$0xff] }
 0xc79   : > { %v1306_v18 = vsel %vm414_vm5, %v1275_v16, -inf  ;;  %v1297_v19 = vpop.f32.mrf.mxu2 }
 0xc7a   : > { %1307 = vmax.xlane.f32.xlu1 %v1306_v18  ;;  %v1298_v20 = vadd.f32 %v1297_v19, %v2385_v60 }
 0xc7c   : > { %v1309_v21 = vsel %vm414_vm5, %v1298_v20, -inf }
 0xc82   : > { %1310 = vmax.xlane.f32.xlu1 %v1309_v21 }
 0xce3   : > { %v1302_v22 = vpop.xlane.xlu0 %1301 }
 0xce4   : > { %v1312_v24 = vsub.f32 %v1229_v11, %v1302_v22 }
 0xce6   : > { %v1316_v25 = vmul.f32 1.442695, %v1312_v24 }
 0xce8   : > { %2087 = vpow2.f32 %v1316_v25 }
 0xceb   : > { %v1305_v26 = vpop.xlane.xlu2 %1304 }
 0xcec   : > { %v1313_v27 = vsub.f32 %v1252_v14, %v1305_v26 }
 0xced   : > { %v1308_v28 = vpop.xlane.xlu1 %1307 }
 0xcee   : > { %v2088_v29 = vpop.eup %2087  ;;  %v1318_v30 = vmul.f32 1.442695, %v1313_v27  ;;  %v1314_v31 = vsub.f32 %v1275_v16, %v1308_v28  ;;  %v1669_v16 = vld [vmem:[#allocation5 + $0x1a0] sm:$0xff] }
 0xcef   : > { %v1324_v59 = vsel %vm414_vm5, %v2088_v29, 0.0  ;;  %1689 = vmatpush.msrb.mxu2 %v1669_v16  ;;  %v2054_v28 = vld [vmem:[#allocation5 + $0x180] ss:$0 sm:$0xff] }
 0xcf0   : > { %2089 = vpow2.f32 %v1318_v30  ;;  %v1320_v32 = vmul.f32 1.442695, %v1314_v31  ;;  %1325 = vadd.xlane.f32.xlu1 %v1324_v59  ;;  %v2055_v31 = vld [vmem:[#allocation5 + $0x188] ss:$0 sm:$0xff] }
 0xcf2   : > { %2091 = vpow2.f32 %v1320_v32 }
 0xcf5   : > { %v1311_v60 = vpop.xlane.xlu1 %1310 }
 0xcf6   : > { %v2090_v33 = vpop.eup %2089  ;;  %v1315_v34 = vsub.f32 %v1298_v20, %v1311_v60  ;;  %v1755_v60 = vld [vmem:[#allocation5 + $0x230] sm:$0xff] }
 0xcf7   : > { %v1327_v35 = vsel %vm414_vm5, %v2090_v33, 0.0 }
 0xcf8   : > { %v2092_v36 = vpop.eup %2091  ;;  %v1322_v37 = vmul.f32 1.442695, %v1315_v34  ;;  %1328 = vadd.xlane.f32.xlu1 %v1327_v35  ;;  %v1753_v34 = vld [vmem:[#allocation5 + $0x220] sm:$0xff]  ;;  %v2056_v35 = vld [vmem:[#allocation5 + $0x1b0] ss:$0 sm:$0xff] }
 0xcf9   : > { %v1330_v38 = vsel %vm414_vm5, %v2092_v36, 0.0 }
 0xcfa   : > { %2093 = vpow2.f32 %v1322_v37  ;;  %1331 = vadd.xlane.f32.xlu0 %v1330_v38  ;;  %v1751_v37 = vld [vmem:[#allocation5 + $0x210] sm:$0xff] }
 0xd00   : > { %v2094_v39 = vpop.eup %2093 }
 0xd01   : > { %v1333_v40 = vsel %vm414_vm5, %v2094_v39, 0.0 }
 0xd02   : > { %1334 = vadd.xlane.f32.xlu0 %v1333_v40  ;;  %v1750_v40 = vld [vmem:[#allocation5 + $0x208] sm:$0xff] }
 0xd63   : > { %v1326_v41 = vpop.xlane.xlu1 %1325 }
 0xd64   : > { %2095 = vrcp.f32 %v1326_v41 }
 0xd6a   : > { %v2096_v42 = vpop.eup %2095 }
 0xd6b   : > { %v1340_v43 = vmul.f32 %v2096_v42, %v2088_v29  ;;  %v1329_v44 = vpop.xlane.xlu1 %1328  ;;  %v1749_v42 = vld [vmem:[#allocation5 + $0x200] sm:$0xff] }
 0xd6c   : > { %2097 = vrcp.f32 %v1329_v44  ;;  %v1748_v44 = vld [vmem:[#allocation5 + $0x1f8] sm:$0xff] }
 0xd6d   : > { %v1332_v45 = vpop.xlane.xlu0 %1331  ;;  %1966 = vmatmul.msk.f32.vlgmr.msra.gmra.mxu3 %vm414_vm5, %v1340_v43 }
 0xd6e   : > { %2099 = vrcp.f32 %v1332_v45  ;;  %1756 = vmatpush.msra.mxu3 %v1755_v60 }
 0xd72   : > { %v2098_v46 = vpop.eup %2097 }
 0xd73   : > { %v1341_v47 = vmul.f32 %v2098_v46, %v2090_v33  ;;  %v1754_v33 = vld [vmem:[#allocation5 + $0x228] sm:$0xff]  ;;  %v1747_v46 = vld [vmem:[#allocation5 + $0x1f0] sm:$0xff] }
 0xd74   : > { %v2100_v48 = vpop.eup %2099  ;;  %1757 = vmatpush.msra.mxu3 %v1754_v33 }
 0xd75   : > { %v1342_v49 = vmul.f32 %v2100_v48, %v2092_v36  ;;  %v1335_v50 = vpop.xlane.xlu0 %1334  ;;  %1968 = vmatmul.msk.f32.vlgmr.msra.gmra.mxu1 %vm414_vm5, %v1341_v47  ;;  %v1752_v36 = vld [vmem:[#allocation5 + $0x218] sm:$0xff] }
 0xd76   : > { %2101 = vrcp.f32 %v1335_v50  ;;  %1758 = vmatpush.msra.mxu3 %v1753_v34 }
 0xd77   : > { %1970 = vmatmul.msk.f32.vlgmr.msra.gmra.mxu2 %vm414_vm5, %v1342_v49  ;;  %v1746_v49 = vld [vmem:[#allocation5 + $0x1e8] sm:$0xff] }
 0xd78   : > { %1759 = vmatpush.msra.mxu3 %v1752_v36 }
 0xd7a   : > { %1760 = vmatpush.msra.mxu3 %v1751_v37 }
 0xd7c   : > { %v2102_v51 = vpop.eup %2101  ;;  %1761 = vmatpush.msra.mxu3 %v1750_v40  ;;  %v1809_v40 = vld [vmem:[#allocation5 + $0x258] sm:$0xff] }
 0xd7d   : > { %v1343_v52 = vmul.f32 %v2102_v51, %v2094_v39 }
 0xd7e   : > { %1762 = vmatpush.msra.mxu3 %v1749_v42 }
 0xd7f   : > { %1972 = vmatmul.msk.f32.vlgmr.msrb.gmra.mxu3 %vm414_vm5, %v1343_v52  ;;  %v1745_v52 = vld [vmem:[#allocation5 + $0x1e0] sm:$0xff] }
 0xd80   : > { %1763 = vmatpush.msra.mxu3 %v1748_v44 }
 0xd82   : > { %1764 = vmatpush.msra.mxu3 %v1747_v46 }
 0xd84   : > { %1765 = vmatpush.msra.mxu3 %v1746_v49 }
 0xd86   : > { %1766 = vmatpush.msra.mxu3 %v1745_v52 }
 0xdf0   : > { %v1367_v53 = vpop.f32.mrf.mxu3 }
 0xdf1   : > { %1448 = vxpose.xlu1.b32.start.end [1/1] (short) (narrow) %v1367_v53, 8 }
 0xdf2   : > { %v1393_v54 = vpop.f32.mrf.mxu1 }
 0xdf3   : > { %1480 = vxpose.xlu0.b32.start.end [1/1] (short) (narrow) %v1393_v54, 8 }
 0xdfa   : > { %v1419_v55 = vpop.f32.mrf.mxu2 }
 0xdfb   : > { %1512 = vxpose.xlu0.b32.start.end [1/1] (short) (narrow) %v1419_v55, 8  ;;  %v1744_v55 = vld [vmem:[#allocation5 + $0x1d8] sm:$0xff] }
 0xdfc   : > { %1767 = vmatpush.msra.mxu3 %v1744_v55  ;;  %v2060_v55 = vld [vmem:[#allocation5 + $0x270] ss:$0 sm:$0xff] }
 0xdfe   : > { %1768 = vmatpush.msra.mxu3 %v1743_v57 }
 0xe00   : > { %1769 = vmatpush.msra.mxu3 %v1742_v62 }
 0xe02   : > { %v1445_v56 = vpop.f32.mrf.mxu3 }
 0xe03   : > { %1544 = vxpose.xlu0.b32.start.end [1/1] (short) (narrow) %v1445_v56, 8 }
 0xe95   : > { %v1464_v63 = vpop.trf.xlu1 }
 0xe96   : > { %1576 = vxpose.xlu2.b32.start [1/4] (short) (narrow) %v1464_v63, 8 }
 0xe97   : > { %v1496_v1 = vpop.trf.xlu0 }
 0xe9e   : > { %1577 = vxpose.xlu2.b32.cont [2/4] (short) (narrow) %v1496_v1, 8  ;;  %v1741_v1 = vld [vmem:[#allocation5 + $0x1c0] sm:$0xff] }
 0xe9f   : > { %v1528_v2 = vpop.trf.xlu0  ;;  %1770 = vmatpush.msra.mxu3 %v1741_v1 }
 0xea6   : > { %1578 = vxpose.xlu2.b32.cont [3/4] (short) (narrow) %v1528_v2, 8 }
 0xea7   : > { %v1560_v3 = vpop.trf.xlu0 }
 0xeae   : > { %1579 = vxpose.xlu2.b32.end [4/4] (short) (narrow) %v1560_v3, 8  ;;  %v1740_v3 = vld [vmem:[#allocation5 + $0x1b8] sm:$0xff] }
 0xeaf   : > { %1771 = vmatpush.msra.mxu3 %v1740_v3 }
 0xf2f   : > { %v1592_v4 = vpop.trf.xlu2 }
 0xf30   : > { %1973 = vmatmul.msk.f32.vlgmr.msrb.gmra.mxu1 %vm187_vm0, %v1592_v4 }
 0xfad   : > { %v1632_v0 = vpop.f32.mrf.mxu1 }
 0xfae   : > { %v1635_v6 = vadd.f32 %v1632_v0, %v2419_v23  ;;  %v1668_v23 = vld [vmem:[#allocation5 + $0x198] sm:$0xff] }
 0xfaf   : > { %1690 = vmatpush.msrb.mxu2 %v1668_v23 }
 0xfb0   : > { %v2454_v7 = vadd.f32 %v2053_v5, %v1635_v6 }
 0xfb1   : > { %1691 = vmatpush.msrb.mxu2 %v1667_v17 }
 0xfb2   : > { %v1641_v9 = vsel %vm187_vm0, %v2454_v7, 0.0 }
 0xfb3   : > { %1642 = vadd.xlane.f32.xlu1 %v1641_v9 }
0x1026   : > { %v1643_v10 = vpop.xlane.xlu1 %1642 }
0x1027   : > { %v1644_v11 = vmul.f32 %v1643_v10, %v2370_v8 }
0x1029   : > { %v1645_v12 = vsub.f32 %v2454_v7, %v1644_v11 }
0x102b   : > { %v1646_v13 = vmul.f32 %v1645_v12, %v1645_v12 }
0x102d   : > { %v1647_v14 = vsel %vm187_vm0, %v1646_v13, 0.0 }
0x102e   : > { %1648 = vadd.xlane.f32.xlu0 %v1647_v14 }
0x10a1   : > { %v1649_v18 = vpop.xlane.xlu0 %1648 }
0x10a2   : > { %v1650_v19 = vmul.f32 %v1649_v18, %v2370_v8 }
0x10a4   : > { %v1651_v20 = vadd.f32 1e-05, %v1650_v19 }
0x10a6   : > { %2103 = vrsqrt.f32 %v1651_v20  ;;  %vm1658_vm3 = vweird.f32 %v1651_v20 }
0x10ac   : > { %v2104_v21 = vpop.eup %2103 }
0x10ad   : > { %v1653_v22 = vmul.f32 %v2104_v21, %v1651_v20  ;;  %vm1659_vm2 = vweird.f32 %v2104_v21 }
0x10ae   : > { %vm1660_vm4 = vmor %vm1658_vm3, %vm1659_vm2 }
0x10af   : > { %v1654_v24 = vmul.f32 %v2104_v21, %v1653_v22 }
0x10b1   : > { %v1655_v25 = vmul.f32 0.5, %v1654_v24 }
0x10b3   : > { %v1656_v26 = vsub.f32 1.5, %v1655_v25 }
0x10b5   : > { %v1657_v27 = vmul.f32 %v2104_v21, %v1656_v26 }
0x10b7   : > { %v1661_v29 = vsel %vm1660_vm4, %v2104_v21, %v1657_v27 }
0x10b8   : > { %v1662_v30 = vmul.f32 %v1661_v29, %v1645_v12 }
0x10ba   : > { %v1664_v59 = vmul.f32 %v2054_v28, %v1662_v30  ;;  %v2057_v30 = vld [vmem:[#allocation5 + $0x238] ss:$0 sm:$0xff] }
0x10bc   : > { %v1666_v32 = vadd.f32 %v2055_v31, %v1664_v59 }
0x10be   : > { %1974 = vmatmul.msk.f32.vlgmr.msrb.gmra.mxu2 %vm187_vm0, %v1666_v32 }
0x1141   : > { %v1693_v38 = vpop.f32.mrf.mxu2 }
0x1142   : > { %v2463_v39 = vadd.f32 %v2056_v35, %v1693_v38  ;;  %v1811_v38 = vld [vmem:[#allocation5 + $0x268] sm:$0xff] }
0x1143   : > { %1829 = vmatpush.msrb.mxu0 %v1811_v38 }
0x1144   : > { %v1697_v41 = vmul.f32 0.70710677, %v2463_v39  ;;  %v1696_v27 = vmul.f32 0.5, %v2463_v39  ;;  %v1810_v39 = vld [vmem:[#allocation5 + $0x260] sm:$0xff] }
0x1145   : > { %1830 = vmatpush.msrb.mxu0 %v1810_v39 }
0x1146   : > { %v1698_v43 = vmul.f32 %v1697_v41, %v1697_v41 }
0x1147   : > { %1831 = vmatpush.msrb.mxu0 %v1809_v40 }
0x1148   : > { %v1699_v45 = vmin.f32 %v1698_v43, 16.0 }
0x114a   : > { %v1700_v47 = vmul.f32 2.1237322e-06, %v1699_v45  ;;  %v1711_v48 = vmul.f32 3.8918573e-05, %v1699_v45 }
0x114c   : > { %v1701_v50 = vadd.f32 0.00028619796, %v1700_v47  ;;  %v1712_v51 = vadd.f32 0.001143296, %v1711_v48 }
0x114e   : > { %v1702_v53 = vmul.f32 %v1701_v50, %v1699_v45  ;;  %v1713_v54 = vmul.f32 %v1712_v51, %v1699_v45  ;;  %v2058_v50 = vld [vmem:[#allocation5 + $0x240] ss:$0 sm:$0xff] }
0x1150   : > { %v1714_v56 = vadd.f32 0.014752088, %v1713_v54  ;;  %v1703_v58 = vadd.f32 0.0036580483, %v1702_v53  ;;  %v2059_v53 = vld [vmem:[#allocation5 + $0x248] ss:$0 sm:$0xff] }
0x1152   : > { %v1715_v61 = vmul.f32 %v1714_v56, %v1699_v45  ;;  %v1704_v2 = vmul.f32 %v1703_v58, %v1699_v45 }
0x1154   : > { %v1716_v63 = vadd.f32 0.112945676, %v1715_v61  ;;  %v1705_v0 = vadd.f32 0.05243302, %v1704_v2 }
0x1156   : > { %v1717_v4 = vmul.f32 %v1716_v63, %v1699_v45  ;;  %v1706_v10 = vmul.f32 %v1705_v0, %v1699_v45 }
0x1158   : > { %v1718_v5 = vadd.f32 0.4994258, %v1717_v4  ;;  %v1707_v11 = vadd.f32 0.18741608, %v1706_v10 }
0x115a   : > { %v1719_v6 = vmul.f32 %v1718_v5, %v1699_v45  ;;  %v1708_v13 = vmul.f32 %v1707_v11, %v1699_v45 }
0x115c   : > { %v1720_v9 = vadd.f32 1.0, %v1719_v6  ;;  %v1709_v23 = vadd.f32 1.1283791, %v1708_v13 }
0x115e   : > { %2105 = vrcp.f32 %v1720_v9  ;;  %v1732_v16 = vand.u32 2147483648, %v1720_v9  ;;  %v1730_v18 = vand.u32 2147483647, %v1720_v9  ;;  %vm1726_vm6 = vweird.f32 %v1720_v9 }
0x115f   : > { %v1710_v21 = vmul.f32 %v1709_v23, %v1697_v41  ;;  %v1808_v41 = vld [vmem:[#allocation5 + $0x250] sm:$0xff] }
0x1160   : > { %v1733_v20 = vor.u32 1.1754944e-38, %v1732_v16  ;;  %vm1731_vm8 = vcmp.eq.f32.partialorder %v1730_v18, 8.507059e+37  ;;  %1832 = vmatpush.msrb.mxu0 %v1808_v41 }
0x1164   : > { %v2106_v12 = vpop.eup %2105 }
0x1165   : > { %v1722_v14 = vmul.f32 %v2106_v12, %v1720_v9  ;;  %vm1727_vm5 = vweird.f32 %v2106_v12 }
0x1166   : > { %vm1728_vm7 = vmor %vm1726_vm6, %vm1727_vm5 }
0x1167   : > { %v1723_v15 = vsub.f32 1.0, %v1722_v14 }
0x1169   : > { %v1724_v17 = vmul.f32 %v2106_v12, %v1723_v15 }
0x116b   : > { %v1725_v19 = vadd.f32 %v2106_v12, %v1724_v17 }
0x116d   : > { %v1729_v22 = vsel %vm1728_vm7, %v2106_v12, %v1725_v19 }
0x116e   : > { %v1734_v24 = vsel %vm1731_vm8, %v1733_v20, %v1729_v22 }
0x116f   : > { %v1735_v25 = vmul.f32 %v1734_v24, %v1710_v21 }
0x1171   : > { %v1975_v26 = vclamps-f32 %v1735_v25, 1.0 }
0x1173   : > { %v1738_v28 = vadd.f32 1.0, %v1975_v26 }
0x1175   : > { %v1739_v29 = vmul.f32 %v1738_v28, %v1696_v27 }
0x1177   : > { %1772 = vmatmul.f32.vlgmr.msra.gmra.mxu3 %v1739_v29 }
0x11fa   : > { %v1773_v31 = vpop.f32.mrf.mxu3 }
0x11fb   : > { %v1776_v59 = vadd.f32 %v1773_v31, %v2454_v7 }
0x11fd   : > { %v1779_v32 = vadd.f32 %v2057_v30, %v1776_v59 }
0x11ff   : > { %v1782_v60 = vsel %vm187_vm0, %v1779_v32, 0.0 }
0x1200   : > { %1783 = vadd.xlane.f32.xlu2 %v1782_v60 }
0x1273   : > { %v1784_v33 = vpop.xlane.xlu2 %1783 }
0x1274   : > { %v1785_v34 = vmul.f32 %v1784_v33, %v2370_v8 }
0x1276   : > { %v1786_v35 = vsub.f32 %v1779_v32, %v1785_v34 }
0x1278   : > { %v1787_v36 = vmul.f32 %v1786_v35, %v1786_v35 }
0x127a   : > { %v1788_v37 = vsel %vm187_vm0, %v1787_v36, 0.0 }
0x127b   : > { %1789 = vadd.xlane.f32.xlu1 %v1788_v37 }
0x12ee   : > { %v1790_v7 = vpop.xlane.xlu1 %1789 }
0x12ef   : > { %v1791_v42 = vmul.f32 %v1790_v7, %v2370_v8 }
0x12f1   : > { %v1792_v43 = vadd.f32 1e-05, %v1791_v42 }
0x12f3   : > { %2107 = vrsqrt.f32 %v1792_v43  ;;  %vm1799_vm10 = vweird.f32 %v1792_v43 }
0x12f9   : > { %v2108_v44 = vpop.eup %2107 }
0x12fa   : > { %v1794_v45 = vmul.f32 %v2108_v44, %v1792_v43  ;;  %vm1800_vm9 = vweird.f32 %v2108_v44 }
0x12fb   : > { %vm1801_vm11 = vmor %vm1799_vm10, %vm1800_vm9 }
0x12fc   : > { %v1795_v46 = vmul.f32 %v2108_v44, %v1794_v45 }
0x12fe   : > { %v1796_v47 = vmul.f32 0.5, %v1795_v46 }
0x1300   : > { %v1797_v48 = vsub.f32 1.5, %v1796_v47 }
0x1302   : > { %v1798_v49 = vmul.f32 %v2108_v44, %v1797_v48 }
0x1304   : > { %v1802_v51 = vsel %vm1801_vm11, %v2108_v44, %v1798_v49 }
0x1305   : > { %v1803_v52 = vmul.f32 %v1802_v51, %v1786_v35 }
0x1307   : > { %v1805_v54 = vmul.f32 %v2058_v50, %v1803_v52 }
0x1309   : > { %v1807_v8 = vadd.f32 %v2059_v53, %v1805_v54 }
0x130b   : > { %1976 = vmatmul.msk.f32.vlgmr.msrb.gmra.mxu0 %vm187_vm0, %v1807_v8 }
0x1388   : > { %v1834_v56 = vpop.f32.mrf.mxu0 }
0x1389   : > { %v1835_v57 = vadd.f32 %v2060_v55, %v1834_v56 }
0x138b   : > { %1837 = vst [vmem:[%s177_s13] sm:$0xff] %v1835_v57 }
0x138c   : > { %2196 = shalt.err (!%p2193_p9)
}
0x138d   : > { %1987 = dma.vmem_to_hbm [thread:$0]  (%p2321_p13), %s1852_s14, 128, %s1854_s15, %s1839_s18  }
0x138e PF: > { %s1865_s3 = sand.u32 1, %s2227_s9   ;;  %p2516_p10 = scmp.ge.s32.totalorder %s2239_s12, 2 }
0x138f   : > { %s1866_s29 = scalar_lea.sflag [#allocation4], %s1865_s3 }
0x1390   : > { %p1998_p11 = pnand %p2516_p10, %p2326_p4 }
0x1392   : > { %p1999_p0 = pneg %p1998_p11 }
0x1394   : > { %2222 = dma.done.wait (%p1999_p0), %s1866_s29, 128  }
0x1395   : > { %2224 = vsyncadd (%p1999_p0), %s1866_s29, 4294967168  ;;  %p16_p2 = scmp.ge.s32.totalorder %s2301_s23, 4   ;;  %s2517_s9 = smov %s2231_s10 }
0x1396   : > { %s2518_s10 = smov %s2235_s11  ;;  %s2519_s11 = smov %s2313_s26 }
0x1397   : > { %s2520_s12 = smov %s2301_s23  ;;  %18 = sbr.rel (!%p16_p2) target bundleno = 6 (0x6), region = 77 }
0x139c   :  { %1872 = vsyncpa [#allocation3], 1 }
0x139d   :  { %1874 = vsyncpa [#allocation3 + $0x1], 1 }
0x139e   :  { %1875 = vsyncpa [#allocation6], 1 }
0x139f   :  { %1876 = vsyncpa [#allocation4], 1 }
0x13a0   :  { %1878 = vsyncpa [#allocation4 + $0x1], 1 }

</bundles_post_ra>
